<compile_context>
chip_gen: v6e
topology: v6e:2x2x1
jax: 0.10.0
libtpu: 0.0.40
codegen_flags: <defaults>
</compile_context>

<pallas_src>
import functools
import math

import jax
import jax.numpy as jnp
from jax.experimental import pallas as pl
from jax.experimental.pallas import tpu as pltpu


def _vmem_capacity_bytes():
    """Physical per-core VMEM; conservative 64 MiB (v7x) fallback."""
    try:
        info = pltpu.get_tpu_info()
        cap = int(getattr(info, "vmem_capacity_bytes", 0) or 0)
        if cap > 0:
            return cap
    except Exception:
        pass
    return 64 * 2**20


def _make_kernel(has_grp, stats_dtype, precision):
    """Fused conv-matmul + pos add + LayerNorm kernel body."""

    def body(x_ref, w_ref, pos_ref, g_ref, b_ref, a_ref, o_ref):
        # x_ref:   (tm, Kp)  packed patches (compute dtype)
        # w_ref:   (Kp, L)   packed block-diagonal conv weight (compute dtype)
        # pos_ref: (tm, L)   packed pos emb + conv bias (f32), grid-invariant
        # g_ref:   (1, L)    packed LN gamma (f32)
        # b_ref:   (1, L)    packed LN beta  (f32)
        # a_ref:   (L, L)    per-token group-mean matrix, or None if p == 1
        # o_ref:   (tm, L)   packed output, lane-dense full-width stores
        x = jnp.dot(x_ref[...], w_ref[...],
                    preferred_element_type=jnp.float32, precision=precision)
        x = x + pos_ref[...]

        if a_ref is None:
            mu = jnp.mean(x, axis=-1, keepdims=True)
            d = x - mu
            var = jnp.mean(d * d, axis=-1, keepdims=True)
        else:
            a = a_ref[...]
            # Each output lane gets the mean of its own token-group of lanes.
            # Stats matmul inputs in stats_dtype (bf16 on the perf path: the
            # MXU work stays cheap on v5e); accumulation is f32.
            mu = jnp.dot(x.astype(stats_dtype), a,
                         preferred_element_type=jnp.float32, precision=precision)
            d = x - mu
            var = jnp.dot((d * d).astype(stats_dtype), a,
                          preferred_element_type=jnp.float32, precision=precision)

        y = d * jax.lax.rsqrt(var + 1e-6) * g_ref[...] + b_ref[...]
        o_ref[...] = y.astype(o_ref.dtype)

    if has_grp:
        def kernel(x_ref, w_ref, pos_ref, g_ref, b_ref, a_ref, o_ref):
            body(x_ref, w_ref, pos_ref, g_ref, b_ref, a_ref, o_ref)
    else:
        def kernel(x_ref, w_ref, pos_ref, g_ref, b_ref, o_ref):
            body(x_ref, w_ref, pos_ref, g_ref, b_ref, None, o_ref)
    return kernel


@functools.partial(jax.jit,
                   static_argnames=("patch_size", "compute_dtype", "out_dtype"))
def bsmamba_block_forward(x_nchw, conv_w, conv_b, pos_emb, ln_w, ln_b, *,
                          patch_size, compute_dtype=jnp.bfloat16,
                          out_dtype=None):
    """x_nchw: (B, C, H, W). Returns (encoded (B, N, hidden), None)."""
    B, C, H, W = x_nchw.shape
    P = patch_size
    Hp, Wp = H // P, W // P
    N = Hp * Wp
    hidden = conv_w.shape[0]
    K = C * P * P
    M = B * N
    f32 = jnp.float32
    cdt = compute_dtype
    odt = cdt if out_dtype is None else out_dtype
    exact_f32 = (jnp.dtype(cdt) == jnp.dtype(jnp.float32))
    precision = jax.lax.Precision.HIGHEST if exact_f32 else None

    # im2col for the stride==kernel patch conv; channel order (c, ph, pw)
    # matches PyTorch Conv2d weight flattening (out, in, kH, kW).  Under jit
    # the compute-dtype cast fuses with the transpose copy, so the im2col
    # intermediate is written once in the (narrow) compute dtype.
    patches = x_nchw.reshape(B, C, Hp, P, Wp, P).transpose(0, 2, 4, 1, 3, 5)
    patches = patches.reshape(M, K).astype(cdt)

    # Lane packing: p tokens per 128-lane row when hidden < 128.
    if hidden % 128 == 0:
        p_pack = 1
    elif 128 % hidden == 0 and N % (128 // hidden) == 0:
        p_pack = 128 // hidden
    else:
        p_pack = 1
    L = p_pack * hidden
    Kp = p_pack * K
    Mp = M // p_pack
    rows_img = N // p_pack              # packed rows per image (pos period)

    w_flat = conv_w.reshape(hidden, K).T.astype(f32)                 # (K, hidden)
    # Fold the conv bias into the position embeddings (done once, not per tile).
    posb = (pos_emb.reshape(N, hidden) + conv_b.reshape(1, hidden)).astype(f32)
    posb_p = posb.reshape(rows_img, L)                               # packed pattern

    if p_pack > 1:
        # Block-diagonal weight: (X packed) @ kron(I_p, W) == packed conv out.
        w_p = jnp.kron(jnp.eye(p_pack, dtype=f32), w_flat).astype(cdt)
        grp = jnp.kron(jnp.eye(p_pack, dtype=f32),
                       jnp.full((hidden, hidden), 1.0 / hidden, dtype=f32))
        grp = grp.astype(f32 if exact_f32 else cdt)                  # (L, L)
    else:
        w_p = w_flat.astype(cdt)
        grp = None
    g_p = jnp.tile(ln_w.reshape(1, hidden).astype(f32), (1, p_pack))  # (1, L)
    b_p = jnp.tile(ln_b.reshape(1, hidden).astype(f32), (1, p_pack))  # (1, L)

    x_p = patches.reshape(Mp, Kp)                                     # contiguous

    # ---- VMEM-budgeted, generation-aware tile sizing -----------------------
    csize = jnp.dtype(cdt).itemsize
    osize = jnp.dtype(odt).itemsize
    vmem_cap = _vmem_capacity_bytes()                # 64 MiB v7x, 128 MiB v5e/v6e
    budget = int(vmem_cap * 0.7)                     # headroom for compiler temps

    per_row = 2 * (Kp * csize + L * 4 + L * osize)   # x + pos + out, double-buffered
    fixed = (2 * Kp * L * csize
             + (2 * L * L * (4 if exact_f32 else csize) if p_pack > 1 else 0)
             + 4 * L * 4 + (1 << 20))

    sub = max(8, 32 // csize)                        # sublane multiple (8 f32 / 16 bf16)
    unit = (rows_img * sub) // math.gcd(rows_img, sub)   # lcm(rows_img, sub)
    max_rows = max(sub, (budget - fixed) // max(per_row, 1))

    if max_rows >= unit:
        # Grid-invariant position block: every tile covers whole repeats of the
        # per-image packed pos pattern, so one (tm, L) block serves all tiles.
        tm_vmem = (max_rows // unit) * unit
        tm_par = max(unit, ((Mp // 8) // unit) * unit)   # aim for >= 8 grid steps
        cap_rows = max(unit, (2048 // unit) * unit)
        tm = max(unit, min(tm_vmem, tm_par, cap_rows))
        tm = min(tm, ((Mp + unit - 1) // unit) * unit)
        pos_tiled = False
    else:
        # One pattern repeat doesn't fit VMEM: stream a per-tile pos block.
        tm = max(sub, min((max_rows // sub) * sub, 2048))
        pos_tiled = True

    Mp_pad = ((Mp + tm - 1) // tm) * tm
    if Mp_pad > Mp:
        x_p = jnp.pad(x_p, ((0, Mp_pad - Mp), (0, 0)))
    grid = (Mp_pad // tm,)

    if not pos_tiled:
        pos_op = jnp.tile(posb_p, (tm // rows_img, 1))            # (tm, L), read once
        pos_spec = pl.BlockSpec((tm, L), lambda i: (0, 0))
    else:
        pos_op = jnp.tile(posb_p, (B, 1))                         # (Mp, L)
        if Mp_pad > Mp:
            pos_op = jnp.pad(pos_op, ((0, Mp_pad - Mp), (0, 0)))
        pos_spec = pl.BlockSpec((tm, L), lambda i: (i, 0))

    in_specs = [
        pl.BlockSpec((tm, Kp), lambda i: (i, 0)),    # packed patches
        pl.BlockSpec((Kp, L), lambda i: (0, 0)),     # packed conv weight (invariant)
        pos_spec,                                    # packed pos emb (+ conv bias)
        pl.BlockSpec((1, L), lambda i: (0, 0)),      # LN gamma
        pl.BlockSpec((1, L), lambda i: (0, 0)),      # LN beta
    ]
    operands = [x_p, w_p, pos_op, g_p, b_p]
    if p_pack > 1:
        in_specs.append(pl.BlockSpec((L, L), lambda i: (0, 0)))   # group-mean matrix
        operands.append(grp)

    kernel = _make_kernel(p_pack > 1, f32 if exact_f32 else cdt, precision)

    # Advisory cost estimate (includes the p-fold block-diagonal MXU work).
    flops = 2 * Mp_pad * Kp * L + (4 * Mp_pad * L * L if p_pack > 1 else 0) \
            + 10 * Mp_pad * L
    bytes_accessed = (Mp_pad * Kp * csize + Kp * L * csize
                      + pos_op.size * 4 + (g_p.size + b_p.size) * 4
                      + (L * L * jnp.dtype(grp.dtype).itemsize if p_pack > 1 else 0)
                      + Mp_pad * L * osize)
    cost = pl.CostEstimate(flops=int(flops), transcendentals=int(Mp_pad * L),
                           bytes_accessed=int(bytes_accessed))

    need = fixed + per_row * tm
    vmem_limit = int(min(vmem_cap, max(need + (8 << 20), 32 << 20)))

    out = pl.pallas_call(
        kernel,
        out_shape=jax.ShapeDtypeStruct((Mp_pad, L), odt),
        grid=grid,
        in_specs=in_specs,
        out_specs=pl.BlockSpec((tm, L), lambda i: (i, 0)),
        compiler_params=pltpu.CompilerParams(
            dimension_semantics=("parallel",),
            vmem_limit_bytes=vmem_limit),
        cost_estimate=cost,
    )(*operands)

    encoded = out[:Mp].reshape(B, N, hidden)   # contiguous (free) un-packing
    features = None                            # non-hybrid Embeddings path
    return encoded, features


def _reference(x_nchw, conv_w, conv_b, pos_emb, ln_w, ln_b, patch_size):
    """Pure-JAX reference of the same forward pass (sanity check)."""
    B, C, H, W = x_nchw.shape
    P = patch_size
    Hp, Wp = H // P, W // P
    N = Hp * Wp
    hidden = conv_w.shape[0]
    patches = x_nchw.reshape(B, C, Hp, P, Wp, P).transpose(0, 2, 4, 1, 3, 5)
    patches = patches.reshape(B, N, C * P * P)
    x = jnp.dot(patches, conv_w.reshape(hidden, -1).T,
                precision=jax.lax.Precision.HIGHEST) + conv_b
    x = x + pos_emb
    mean = jnp.mean(x, axis=-1, keepdims=True)
    var = jnp.mean((x - mean) ** 2, axis=-1, keepdims=True)
    return (x - mean) / jnp.sqrt(var + 1e-6) * ln_w + ln_b


if __name__ == "__main__":
    # Small config consistent with the module: img 16x16, patch 4x4,
    # in_channels=3, hidden_size=32, n_patches=16.
    B, C, IMG, P, HID = 2, 3, 16, 4, 32
    N = (IMG // P) * (IMG // P)

    key = jax.random.PRNGKey(0)
    kx, kw, kb, kp, kg, kbt = jax.random.split(key, 6)
    x = jax.random.normal(kx, (B, C, IMG, IMG), dtype=jnp.float32)
    conv_w = 0.05 * jax.random.normal(kw, (HID, C, P, P), dtype=jnp.float32)
    conv_b = 0.01 * jax.random.normal(kb, (HID,), dtype=jnp.float32)
    pos_emb = 0.02 * jax.random.normal(kp, (1, N, HID), dtype=jnp.float32)
    ln_w = 1.0 + 0.01 * jax.random.normal(kg, (HID,), dtype=jnp.float32)
    ln_b = 0.01 * jax.random.normal(kbt, (HID,), dtype=jnp.float32)

    ref = _reference(x, conv_w, conv_b, pos_emb, ln_w, ln_b, P)

    # f32 path: exact semantics of the PyTorch module (Precision.HIGHEST dots).
    out_f32, features = bsmamba_block_forward(
        x, conv_w, conv_b, pos_emb, ln_w, ln_b,
        patch_size=P, compute_dtype=jnp.float32, out_dtype=jnp.float32)
    out_f32 = jax.block_until_ready(out_f32)
    assert out_f32.shape == (B, N, HID)
    assert features is None
    err_f32 = float(jnp.max(jnp.abs(out_f32 - ref)))
    assert err_f32 < 1e-3, f"f32 path mismatch vs reference: {err_f32}"

    # bf16 perf path (default): bf16 matmul operands, bf16 writeback, f32 LN
    # accumulation.  Loose sanity bound covering bf16 rounding of inputs/output.
    out_bf16, _ = bsmamba_block_forward(
        x, conv_w, conv_b, pos_emb, ln_w, ln_b,
        patch_size=P, compute_dtype=jnp.bfloat16)
    out_bf16 = jax.block_until_ready(out_bf16)
    assert out_bf16.shape == (B, N, HID)
    assert out_bf16.dtype == jnp.bfloat16
    err_bf16 = float(jnp.max(jnp.abs(out_bf16.astype(jnp.float32) - ref)))
    assert err_bf16 < 1e-1, f"bf16 path mismatch vs reference: {err_bf16}"

    print("KERNEL_OK")
</pallas_src>

<mosaic_0001>
module attributes {stable_mosaic.version = 11 : i64} {
  func.func @kernel(%arg0: i32, %arg1: memref<8x192xf32, #tpu.memory_space<vmem>>, %arg2: memref<192x128xf32, #tpu.memory_space<vmem>>, %arg3: memref<8x128xf32, #tpu.memory_space<vmem>>, %arg4: memref<1x128xf32, #tpu.memory_space<vmem>>, %arg5: memref<1x128xf32, #tpu.memory_space<vmem>>, %arg6: memref<128x128xf32, #tpu.memory_space<vmem>>, %arg7: memref<8x128xf32, #tpu.memory_space<vmem>>) attributes {dimension_semantics = [#tpu.dimension_semantics<parallel>], iteration_bounds = array<i64: 1>, scalar_prefetch = 0 : i64, scratch_operands = 0 : i64, tpu.core_type = #tpu.core_type<tc>, window_params = [{transform_indices = @transform_0, window_bounds = array<i64: 8, 192>}, {pipeline_mode = #tpu.pipeline_mode<synchronous>, transform_indices = @transform_1, window_bounds = array<i64: 192, 128>}, {pipeline_mode = #tpu.pipeline_mode<synchronous>, transform_indices = @transform_2, window_bounds = array<i64: 8, 128>}, {pipeline_mode = #tpu.pipeline_mode<synchronous>, transform_indices = @transform_3, window_bounds = array<i64: 1, 128>}, {pipeline_mode = #tpu.pipeline_mode<synchronous>, transform_indices = @transform_4, window_bounds = array<i64: 1, 128>}, {pipeline_mode = #tpu.pipeline_mode<synchronous>, transform_indices = @transform_5, window_bounds = array<i64: 128, 128>}, {transform_indices = @transform_6, window_bounds = array<i64: 8, 128>}]} {
    %c0 = arith.constant 0 : index
    %c0_0 = arith.constant 0 : index
    %0 = vector.load %arg1[%c0, %c0_0] : memref<8x192xf32, #tpu.memory_space<vmem>>, vector<8x192xf32>
    %c0_1 = arith.constant 0 : index
    %c0_2 = arith.constant 0 : index
    %1 = vector.load %arg2[%c0_1, %c0_2] : memref<192x128xf32, #tpu.memory_space<vmem>>, vector<192x128xf32>
    %cst = arith.constant dense<0.000000e+00> : vector<8x128xf32>
    %2 = tpu.matmul %0, %1, %cst {dimension_numbers = #tpu.dot_dimension_numbers<[1], [0], [0], [1], [0, 0, 1, 1], [], []>, precision = #tpu.contract_precision<fp32>} : vector<8x192xf32>, vector<192x128xf32>, vector<8x128xf32> -> vector<8x128xf32>
    %c0_3 = arith.constant 0 : index
    %c0_4 = arith.constant 0 : index
    %3 = vector.load %arg3[%c0_3, %c0_4] : memref<8x128xf32, #tpu.memory_space<vmem>>, vector<8x128xf32>
    %4 = arith.addf %2, %3 : vector<8x128xf32>
    %c0_5 = arith.constant 0 : index
    %c0_6 = arith.constant 0 : index
    %5 = vector.load %arg6[%c0_5, %c0_6] : memref<128x128xf32, #tpu.memory_space<vmem>>, vector<128x128xf32>
    %cst_7 = arith.constant dense<0.000000e+00> : vector<8x128xf32>
    %6 = tpu.matmul %4, %5, %cst_7 {dimension_numbers = #tpu.dot_dimension_numbers<[1], [0], [0], [1], [0, 0, 1, 1], [], []>, precision = #tpu.contract_precision<fp32>} : vector<8x128xf32>, vector<128x128xf32>, vector<8x128xf32> -> vector<8x128xf32>
    %7 = arith.subf %4, %6 : vector<8x128xf32>
    %8 = arith.mulf %7, %7 : vector<8x128xf32>
    %cst_8 = arith.constant dense<0.000000e+00> : vector<8x128xf32>
    %9 = tpu.matmul %8, %5, %cst_8 {dimension_numbers = #tpu.dot_dimension_numbers<[1], [0], [0], [1], [0, 0, 1, 1], [], []>, precision = #tpu.contract_precision<fp32>} : vector<8x128xf32>, vector<128x128xf32>, vector<8x128xf32> -> vector<8x128xf32>
    %cst_9 = arith.constant 9.99999997E-7 : f32
    %10 = vector.broadcast %cst_9 : f32 to vector<8x128xf32>
    %11 = arith.addf %9, %10 : vector<8x128xf32>
    %12 = math.rsqrt %11 : vector<8x128xf32>
    %13 = arith.mulf %7, %12 : vector<8x128xf32>
    %c0_10 = arith.constant 0 : index
    %c0_11 = arith.constant 0 : index
    %14 = vector.load %arg4[%c0_10, %c0_11] : memref<1x128xf32, #tpu.memory_space<vmem>>, vector<1x128xf32>
    %15 = vector.broadcast %14 : vector<1x128xf32> to vector<8x128xf32>
    %16 = arith.mulf %13, %15 : vector<8x128xf32>
    %c0_12 = arith.constant 0 : index
    %c0_13 = arith.constant 0 : index
    %17 = vector.load %arg5[%c0_12, %c0_13] : memref<1x128xf32, #tpu.memory_space<vmem>>, vector<1x128xf32>
    %18 = vector.broadcast %17 : vector<1x128xf32> to vector<8x128xf32>
    %19 = arith.addf %16, %18 : vector<8x128xf32>
    %c0_14 = arith.constant 0 : index
    %c0_15 = arith.constant 0 : index
    %20 = vector.load %arg7[%c0_14, %c0_15] : memref<8x128xf32, #tpu.memory_space<vmem>>, vector<8x128xf32>
    tpu.vector_store %arg7[%c0_14, %c0_15], %19 {strides = array<i32>} : memref<8x128xf32, #tpu.memory_space<vmem>>, vector<8x128xf32>,
    return
  }
  func.func @transform_0(%arg0: i32) -> (i32, i32) {
    %c0_i32 = arith.constant 0 : i32
    %c0_i32_0 = arith.constant 0 : i32
    return %arg0, %c0_i32 : i32, i32
  }
  func.func @transform_1(%arg0: i32) -> (i32, i32) {
    %c0_i32 = arith.constant 0 : i32
    %c0_i32_0 = arith.constant 0 : i32
    %c0_i32_1 = arith.constant 0 : i32
    return %c0_i32, %c0_i32_0 : i32, i32
  }
  func.func @transform_2(%arg0: i32) -> (i32, i32) {
    %c0_i32 = arith.constant 0 : i32
    %c0_i32_0 = arith.constant 0 : i32
    %c0_i32_1 = arith.constant 0 : i32
    return %c0_i32, %c0_i32_0 : i32, i32
  }
  func.func @transform_3(%arg0: i32) -> (i32, i32) {
    %c0_i32 = arith.constant 0 : i32
    %c0_i32_0 = arith.constant 0 : i32
    %c0_i32_1 = arith.constant 0 : i32
    return %c0_i32, %c0_i32_0 : i32, i32
  }
  func.func @transform_4(%arg0: i32) -> (i32, i32) {
    %c0_i32 = arith.constant 0 : i32
    %c0_i32_0 = arith.constant 0 : i32
    %c0_i32_1 = arith.constant 0 : i32
    return %c0_i32, %c0_i32_0 : i32, i32
  }
  func.func @transform_5(%arg0: i32) -> (i32, i32) {
    %c0_i32 = arith.constant 0 : i32
    %c0_i32_0 = arith.constant 0 : i32
    %c0_i32_1 = arith.constant 0 : i32
    return %c0_i32, %c0_i32_0 : i32, i32
  }
  func.func @transform_6(%arg0: i32) -> (i32, i32) {
    %c0_i32 = arith.constant 0 : i32
    %c0_i32_0 = arith.constant 0 : i32
    return %arg0, %c0_i32 : i32, i32
  }
}

</mosaic_0001>

<bundles_post_ra>
// kernel: bsmamba_block_forward.1
= control target key start
LH: loop header
LB: loop body
LE: loop exit
PB: predicated region body
PF: predicated region fallthrough
CT: control target
= control target key end

     0   :  { %v4156_v0 = vmov 0.0   ;;  %vm50_vm0 = vcmask 523264   ;;  %vm2766_vm1 = vmmov 0   ;;  %s4107_s1 = inlined_call_operand.vmem [shape: f32[192,128], index: 1, kind: input, shape index: {}]   ;;  %s4108_s0 = inlined_call_operand.vmem [shape: f32[8,192], index: 0, kind: input, shape index: {}]   ;;  %s4109_s5 = inlined_call_operand.vmem [shape: f32[128,128], index: 5, kind: input, shape index: {}]   ;;  %s4110_s2 = inlined_call_operand.vmem [shape: f32[8,128], index: 2, kind: input, shape index: {}]   ;;  %s4111_s3 = inlined_call_operand.vmem [shape: f32[1,128], index: 3, kind: input, shape index: {}]   ;;  %s4112_s4 = inlined_call_operand.vmem [shape: f32[1,128], index: 4, kind: input, shape index: {}]   ;;  %s4113_s6 = inlined_call_operand.vmem [shape: f32[8,128], index: 6, kind: output, shape index: {}]  }
   0x1   :  { %54 = vmatprep.subr.mxu0 %v4156_v0  ;;  %v40_v1 = vld [vmem:[%s4107_s1 + $0x78] sm:$0xff]  ;;  %v39_v2 = vld [vmem:[%s4107_s1 + $0x70] sm:$0xff]  ;;  %v38_v3 = vld [vmem:[%s4107_s1 + $0x68] sm:$0xff]  ;;  %158 = vmatprep.subr.mxu1 %v4156_v0 }
   0x2   :  { %v2813_v4 = vand.u32 4294901760, %v40_v1  ;;  %v2815_v5 = vand.u32 4294901760, %v39_v2  ;;  %v2817_v6 = vand.u32 4294901760, %v38_v3  ;;  %v37_v7 = vld [vmem:[%s4107_s1 + $0x60] sm:$0xff]  ;;  %v36_v8 = vld [vmem:[%s4107_s1 + $0x58] sm:$0xff]  ;;  %v35_v9 = vld [vmem:[%s4107_s1 + $0x50] sm:$0xff] }
   0x3   :  { %v2828_v10 = vand.u32 4294901760, %v37_v7  ;;  %v2830_v11 = vand.u32 4294901760, %v36_v8  ;;  %v2832_v12 = vand.u32 4294901760, %v35_v9  ;;  %v34_v13 = vld [vmem:[%s4107_s1 + $0x48] sm:$0xff]  ;;  %v33_v14 = vld [vmem:[%s4107_s1 + $0x40] sm:$0xff]  ;;  %v32_v19 = vld [vmem:[%s4107_s1 + $0x38] sm:$0xff] }
   0x4   :  { %56 = vmatpush1.msra.mxu0 %v2813_v4  ;;  %v2842_v15 = vsub.f32 %v40_v1, %v2813_v4  ;;  %v2845_v16 = vsub.f32 %v39_v2, %v2815_v5  ;;  %v2847_v17 = vand.u32 4294901760, %v34_v13  ;;  %v2850_v18 = vsub.f32 %v38_v3, %v2817_v6  ;;  %v31_v26 = vld [vmem:[%s4107_s1 + $0x30] sm:$0xff]  ;;  %v30_v34 = vld [vmem:[%s4107_s1 + $0x28] sm:$0xff]  ;;  %v29_v41 = vld [vmem:[%s4107_s1 + $0x20] sm:$0xff] }
   0x5   :  { %57 = vmatprep.subr.mxu0 %v4156_v0  ;;  %v2857_v20 = vsub.f32 %v37_v7, %v2828_v10  ;;  %v2860_v21 = vsub.f32 %v36_v8, %v2830_v11  ;;  %v2866_v25 = vand.u32 4294901760, %v33_v14  ;;  %v2873_v28 = vand.u32 4294901760, %v32_v19  ;;  %v28_v47 = vld [vmem:[%s4107_s1 + $0x18] sm:$0xff]  ;;  %v27_v53 = vld [vmem:[%s4107_s1 + $0x10] sm:$0xff]  ;;  %v26_v61 = vld [vmem:[%s4107_s1 + $0x8] sm:$0xff] }
   0x6   :  { %59 = vmatpush1.msra.mxu0 %v2815_v5  ;;  %v4130_v22 = vand.u32 4294901760, %v2842_v15  ;;  %v4129_v23 = vand.u32 4294901760, %v2845_v16  ;;  %v4127_v24 = vand.u32 4294901760, %v2850_v18  ;;  %v2877_v30 = vsub.f32 %v35_v9, %v2832_v12  ;;  %v25_v2 = vld [vmem:[%s4107_s1] sm:$0xff] }
   0x7   :  { %60 = vmatprep.subr.mxu0 %v4156_v0  ;;  %v4126_v27 = vand.u32 4294901760, %v2857_v20  ;;  %v4124_v29 = vand.u32 4294901760, %v2860_v21  ;;  %v2893_v35 = vsub.f32 %v34_v13, %v2847_v17  ;;  %v2896_v36 = vand.u32 4294901760, %v31_v26 }
   0x8   :  { %62 = vmatpush1.msra.mxu0 %v2817_v6  ;;  %v162_v31 = vsub.f32 %v2842_v15, %v4130_v22  ;;  %v169_v32 = vsub.f32 %v2845_v16, %v4129_v23  ;;  %v176_v33 = vsub.f32 %v2850_v18, %v4127_v24  ;;  %v4123_v40 = vand.u32 4294901760, %v2877_v30 }
   0x9   :  { %63 = vmatprep.subr.mxu0 %v4156_v0  ;;  %v183_v39 = vsub.f32 %v2857_v20, %v4126_v27  ;;  %v2907_v42 = vand.u32 4294901760, %v30_v34  ;;  %v2910_v43 = vsub.f32 %v33_v14, %v2866_v25  ;;  %v190_v45 = vsub.f32 %v2860_v21, %v4124_v29  ;;  %v41_v27 = vld [vmem:[%s4107_s1 + $0x80] sm:$0xff] }
   0xa   :  { %65 = vmatpush1.msra.mxu0 %v2828_v10  ;;  %v163_v37 = vand.u32 4294901760, %v162_v31  ;;  %v170_v38 = vand.u32 4294901760, %v169_v32  ;;  %v177_v44 = vand.u32 4294901760, %v176_v33  ;;  %v4122_v46 = vand.u32 4294901760, %v2893_v35 }
   0xb   :  { %66 = vmatprep.subr.mxu0 %v4156_v0  ;;  %v2921_v48 = vsub.f32 %v32_v19, %v2873_v28  ;;  %v2925_v49 = vand.u32 4294901760, %v29_v41  ;;  %v184_v50 = vand.u32 4294901760, %v183_v39  ;;  %v197_v51 = vsub.f32 %v2877_v30, %v4123_v40 }
   0xc   :  { %68 = vmatpush1.msra.mxu0 %v2830_v11  ;;  %164 = vmatpush1.msra.mxu1 %v163_v37  ;;  %v4120_v52 = vand.u32 4294901760, %v2910_v43  ;;  %v2936_v54 = vsub.f32 %v31_v26, %v2896_v36  ;;  %v2940_v55 = vand.u32 4294901760, %v28_v47  ;;  %v191_v56 = vand.u32 4294901760, %v190_v45  ;;  %v48_v26 = vld [vmem:[%s4107_s1 + $0xb8] sm:$0xff]  ;;  %v46_v45 = vld [vmem:[%s4107_s1 + $0xa8] sm:$0xff] }
   0xd   :  { %69 = vmatprep.subr.mxu0 %v4156_v0  ;;  %165 = vmatprep.subr.mxu1 %v4156_v0  ;;  %v204_v57 = vsub.f32 %v2893_v35, %v4122_v46  ;;  %v4119_v58 = vand.u32 4294901760, %v2921_v48  ;;  %v2948_v59 = vsub.f32 %v30_v34, %v2907_v42  ;;  %v2952_v60 = vand.u32 4294901760, %v27_v53  ;;  %v47_v34 = vld [vmem:[%s4107_s1 + $0xb0] sm:$0xff] }
   0xe   :  { %71 = vmatpush1.msra.mxu0 %v2832_v12  ;;  %171 = vmatpush1.msra.mxu1 %v170_v38  ;;  %v198_v62 = vand.u32 4294901760, %v197_v51  ;;  %v211_v63 = vsub.f32 %v2910_v43, %v4120_v52  ;;  %v4117_v1 = vand.u32 4294901760, %v2936_v54  ;;  %v2966_v3 = vsub.f32 %v29_v41, %v2925_v49  ;;  %v24_v51 = vld [vmem:[%s4108_s0 + $0x8] sm:$0xff] }
   0xf   :  { %72 = vmatprep.subr.mxu0 %v4156_v0  ;;  %172 = vmatprep.subr.mxu1 %v4156_v0  ;;  %v2971_v7 = vsub.f32 %v28_v47, %v2940_v55  ;;  %v205_v8 = vand.u32 4294901760, %v204_v57  ;;  %v218_v9 = vsub.f32 %v2921_v48, %v4119_v58  ;;  %v2977_v13 = vand.u32 4294901760, %v26_v61 }
  0x10   :  { %74 = vmatpush1.msra.mxu0 %v2847_v17  ;;  %178 = vmatpush1.msra.mxu1 %v177_v44  ;;  %v4116_v14 = vand.u32 4294901760, %v2948_v59  ;;  %v2982_v19 = vand.u32 4294901760, %v25_v2  ;;  %v212_v31 = vand.u32 4294901760, %v211_v63  ;;  %v225_v32 = vsub.f32 %v2936_v54, %v4117_v1 }
  0x11   :  { %75 = vmatprep.subr.mxu0 %v4156_v0  ;;  %179 = vmatprep.subr.mxu1 %v4156_v0  ;;  %v4114_v33 = vand.u32 4294901760, %v2966_v3  ;;  %v2996_v37 = vsub.f32 %v27_v53, %v2952_v60  ;;  %v4115_v38 = vand.u32 4294901760, %v2971_v7  ;;  %v219_v39 = vand.u32 4294901760, %v218_v9 }
  0x12   :  { %77 = vmatpush1.msra.mxu0 %v2866_v25  ;;  %185 = vmatpush1.msra.mxu1 %v184_v50  ;;  %v232_v41 = vsub.f32 %v2948_v59, %v4116_v14  ;;  %v3005_v44 = vand.u32 4294901760, %v48_v26  ;;  %v3011_v47 = vsub.f32 %v26_v61, %v2977_v13  ;;  %v3015_v50 = vand.u32 4294901760, %v47_v34  ;;  %v45_v61 = vld [vmem:[%s4107_s1 + $0xa0] sm:$0xff] }
  0x13   :  { %78 = vmatprep.subr.mxu0 %v4156_v0  ;;  %186 = vmatprep.subr.mxu1 %v4156_v0  ;;  %v226_v53 = vand.u32 4294901760, %v225_v32  ;;  %v4118_v57 = vand.u32 4294901760, %v2996_v37  ;;  %v246_v63 = vsub.f32 %v2971_v7, %v4115_v38  ;;  %v23_v38 = vld [vmem:[%s4108_s0] sm:$0xff]  ;;  %v3126_v23 = vand.u32 4294901760, %v41_v27 }
  0x14   :  { %80 = vmatpush1.msra.mxu0 %v2873_v28  ;;  %192 = vmatpush1.msra.mxu1 %v191_v56  ;;  %v239_v56 = vsub.f32 %v2966_v3, %v4114_v33  ;;  %v233_v9 = vand.u32 4294901760, %v232_v41  ;;  %v3041_v32 = vsub.f32 %v48_v26, %v3005_v44  ;;  %v3046_v33 = vand.u32 4294901760, %v45_v61 }
  0x15   :  { %81 = vmatprep.subr.mxu0 %v4156_v0  ;;  %193 = vmatprep.subr.mxu1 %v4156_v0  ;;  %v253_v26 = vsub.f32 %v2996_v37, %v4118_v57  ;;  %v3060_v14 = vsub.f32 %v47_v34, %v3015_v50  ;;  %v247_v1 = vand.u32 4294901760, %v246_v63  ;;  %v43_v34 = vld [vmem:[%s4107_s1 + $0x90] sm:$0xff]  ;;  %v3077_v52 = vand.u32 4294901760, %v23_v38 }
  0x16   :  { %83 = vmatpush1.msra.mxu0 %v2896_v36  ;;  %199 = vmatpush1.msra.mxu1 %v198_v62  ;;  %v3029_v62 = vsub.f32 %v25_v2, %v2982_v19  ;;  %v52_v2 = vsel %vm50_vm0, %v24_v51, 0  ;;  %4163 = vst [vmem:[#allocation2_spill] sm:$0xff] %v3046_v33  ;;  %v44_v51 = vld [vmem:[%s4107_s1 + $0x98] sm:$0xff]  ;;  %v4128_v57 = vand.u32 4294901760, %v3041_v32  ;;  %v3092_v40 = vsub.f32 %v45_v61, %v3046_v33 }
  0x17   :  { %84 = vmatprep.subr.mxu0 %v4156_v0  ;;  %200 = vmatprep.subr.mxu1 %v4156_v0  ;;  %v3081_v63 = vand.u32 4294901760, %v44_v51  ;;  %v4131_v46 = vand.u32 4294901760, %v3060_v14  ;;  %v3096_v29 = vand.u32 4294901760, %v43_v34  ;;  %v3110_v24 = vsub.f32 %v23_v38, %v3077_v52 }
  0x18   :  { %86 = vmatpush1.msra.mxu0 %v2907_v42  ;;  %206 = vmatpush1.msra.mxu1 %v205_v8  ;;  %v3036_v8 = vand.u32 4294901760, %v46_v45  ;;  %v4125_v41 = vand.u32 4294901760, %v3029_v62 }
  0x19   :  { %87 = vmatprep.subr.mxu0 %v4156_v0  ;;  %207 = vmatprep.subr.mxu1 %v4156_v0  ;;  %4164 = vst [vmem:[#allocation3_spill] sm:$0xff] %v3081_v63 }
  0x1a   :  { %89 = vmatpush1.msra.mxu0 %v2925_v49  ;;  %213 = vmatpush1.msra.mxu1 %v212_v31  ;;  %v4121_v31 = vand.u32 4294901760, %v3011_v47  ;;  %v3075_v58 = vsub.f32 %v46_v45, %v3036_v8  ;;  %v42_v45 = vld [vmem:[%s4107_s1 + $0x88] sm:$0xff] }
  0x1b   :  { %90 = vmatprep.subr.mxu0 %v4156_v0  ;;  %214 = vmatprep.subr.mxu1 %v4156_v0 }
  0x1c   :  { %92 = vmatpush1.msra.mxu0 %v2940_v55  ;;  %220 = vmatpush1.msra.mxu1 %v219_v39  ;;  %v240_v39 = vand.u32 4294901760, %v239_v56  ;;  %v260_v56 = vsub.f32 %v3011_v47, %v4121_v31  ;;  %v267_v31 = vsub.f32 %v3029_v62, %v4125_v41  ;;  %v290_v41 = vsub.f32 %v3041_v32, %v4128_v57 }
  0x1d   :  { %93 = vmatprep.subr.mxu0 %v4156_v0  ;;  %221 = vmatprep.subr.mxu1 %v4156_v0  ;;  %v4132_v61 = vand.u32 4294901760, %v3075_v58  ;;  %v297_v57 = vsub.f32 %v3060_v14, %v4131_v46 }
  0x1e   :  { %95 = vmatpush1.msra.mxu0 %v2952_v60  ;;  %227 = vmatpush1.msra.mxu1 %v226_v53  ;;  %v3064_v53 = vand.u32 4294901760, %v52_v2 }
  0x1f   :  { %96 = vmatprep.subr.mxu0 %v4156_v0  ;;  %228 = vmatprep.subr.mxu1 %v4156_v0 }
  0x20   :  { %98 = vmatpush1.msra.mxu0 %v2977_v13  ;;  %234 = vmatpush1.msra.mxu1 %v233_v9  ;;  %v254_v9 = vand.u32 4294901760, %v253_v26  ;;  %v261_v26 = vand.u32 4294901760, %v260_v56  ;;  %v268_v56 = vand.u32 4294901760, %v267_v31  ;;  %v291_v31 = vand.u32 4294901760, %v290_v41 }
  0x21   :  { %99 = vmatprep.subr.mxu0 %v4156_v0  ;;  %235 = vmatprep.subr.mxu1 %v4156_v0  ;;  %v4165_v41 = vand.u32 4294901760, %v3092_v40 }
  0x22   :  { %101 = vmatpush1.msra.mxu0 %v2982_v19  ;;  %241 = vmatpush1.msra.mxu1 %v240_v39  ;;  %v3099_v39 = vsub.f32 %v52_v2, %v3064_v53  ;;  %v3114_v2 = vand.u32 4294901760, %v42_v45 }
  0x23   :  { %118 = vmatprep.subr.mxu0 %v4156_v0  ;;  %242 = vmatprep.subr.mxu1 %v4156_v0 }
  0x24   :  { %120 = vmatpush2.msra.mxu0 %v3005_v44  ;;  %248 = vmatpush1.msra.mxu1 %v247_v1  ;;  %v3117_v1 = vsub.f32 %v44_v51, %v3081_v63  ;;  %v3130_v51 = vsub.f32 %v43_v34, %v3096_v29  ;;  %v3141_v22 = vsub.f32 %v42_v45, %v3114_v2  ;;  %v298_v34 = vand.u32 4294901760, %v297_v57 }
  0x25   :  { %121 = vmatprep.subr.mxu0 %v4156_v0  ;;  %249 = vmatprep.subr.mxu1 %v4156_v0  ;;  %v3154_v45 = vsub.f32 %v41_v27, %v3126_v23 }
  0x26   :  { %123 = vmatpush2.msra.mxu0 %v3015_v50  ;;  %255 = vmatpush1.msra.mxu1 %v254_v9  ;;  %v304_v9 = vsub.f32 %v3075_v58, %v4132_v61  ;;  %v4166_v61 = vand.u32 4294901760, %v3099_v39  ;;  %v331_v38 = vand.u32 4294901760, %v3141_v22 }
  0x27   :  { %124 = vmatprep.subr.mxu0 %v4156_v0  ;;  %256 = vmatprep.subr.mxu1 %v4156_v0 }
  0x28   :  { %126 = vmatpush2.msra.mxu0 %v3036_v8  ;;  %262 = vmatpush1.msra.mxu1 %v261_v26  ;;  %v311_v26 = vsub.f32 %v3092_v40, %v4165_v41  ;;  %v145_v46 = vsub.f32 %v3099_v39, %v4166_v61  ;;  %v305_v57 = vand.u32 4294901760, %v304_v9  ;;  %v4169_v9 = vand.u32 4294901760, %v3130_v51 }
  0x29   :  { %127 = vmatprep.subr.mxu0 %v4156_v0  ;;  %263 = vmatprep.subr.mxu1 %v4156_v0 }
  0x2a   :  { %129 = vmatpush2.msra.mxu0 %v3046_v33  ;;  %269 = vmatpush1.msra.mxu1 %v268_v56  ;;  %v4167_v56 = vand.u32 4294901760, %v3110_v24  ;;  %v4168_v33 = vand.u32 4294901760, %v3117_v1  ;;  %v312_v27 = vand.u32 4294901760, %v311_v26  ;;  %v332_v26 = vsub.f32 %v3141_v22, %v331_v38 }
  0x2b   :  { %130 = vmatprep.subr.mxu0 %v4156_v0  ;;  %286 = vmatprep.subr.mxu1 %v4156_v0 }
  0x2c   :  { %132 = vmatpush2.msra.mxu0 %v3081_v63  ;;  %292 = vmatpush2.msra.mxu1 %v291_v31  ;;  %v151_v41 = vsub.f32 %v3110_v24, %v4167_v56  ;;  %v318_v61 = vsub.f32 %v3117_v1, %v4168_v33  ;;  %v146_v31 = vand.u32 4294901760, %v145_v46  ;;  %v325_v56 = vsub.f32 %v3130_v51, %v4169_v9 }
  0x2d   :  { %133 = vmatprep.subr.mxu0 %v4156_v0  ;;  %293 = vmatprep.subr.mxu1 %v4156_v0  ;;  %v338_v63 = vand.u32 4294901760, %v3154_v45  ;;  %v4172_v9 = vand.u32 4294901760, %v2842_v15 }
  0x2e   :  { %135 = vmatpush2.msra.mxu0 %v3096_v29  ;;  %299 = vmatpush2.msra.mxu1 %v298_v34  ;;  %v152_v33 = vand.u32 4294901760, %v151_v41  ;;  %v319_v34 = vand.u32 4294901760, %v318_v61  ;;  %v326_v46 = vand.u32 4294901760, %v325_v56  ;;  %v333_v41 = vand.u32 4294901760, %v332_v26  ;;  %v819_v26 = vld [vmem:[%s4109_s5 + $0x38] sm:$0xff] }
  0x2f   :  { %136 = vmatprep.subr.mxu0 %v4156_v0  ;;  %300 = vmatprep.subr.mxu1 %v4156_v0  ;;  %v4173_v56 = vand.u32 4294901760, %v2845_v16 }
  0x30   :  { %138 = vmatpush2.msra.mxu0 %v3114_v2  ;;  %306 = vmatpush2.msra.mxu1 %v305_v57  ;;  %v339_v57 = vsub.f32 %v3154_v45, %v338_v63 }
  0x31   :  { %139 = vmatprep.subr.mxu0 %v4156_v0  ;;  %307 = vmatprep.subr.mxu1 %v4156_v0 }
  0x32   :  { %141 = vmatpush2.msra.mxu0 %v3126_v23  ;;  %313 = vmatpush2.msra.mxu1 %v312_v27  ;;  %v340_v61 = vand.u32 4294901760, %v339_v57  ;;  %v4170_v27 = vld [vmem:[#allocation2_spill] sm:$0xff] }
  0x33   :  { %147 = vmatprep.mubr.f32.mxu0 %v146_v31  ;;  %314 = vmatprep.subr.mxu1 %v4156_v0  ;;  %v4171_v31 = vld [vmem:[#allocation3_spill] sm:$0xff] }
  0x34   :  { %350 = vmatprep.subr.mxu0 %v4156_v0  ;;  %153 = vmatmul.mubr.f32.vlgmr.msra.gmra.mxu0 %v152_v33  ;;  %v4174_v33 = vand.u32 4294901760, %v2850_v18 }
  0x35   :  { %320 = vmatpush2.msra.mxu1 %v319_v34  ;;  %353 = vmatpush1.msra.mxu0 %v2842_v15  ;;  %v4175_v15 = vand.u32 4294901760, %v3099_v39  ;;  %v4177_v34 = vand.u32 4294901760, %v3110_v24 }
  0x36   :  { %321 = vmatprep.subr.mxu1 %v4156_v0  ;;  %354 = vmatprep.subr.mxu0 %v4156_v0 }
  0x37   :  { %327 = vmatpush2.msra.mxu1 %v326_v46  ;;  %357 = vmatpush1.msra.mxu0 %v2845_v16  ;;  %v4176_v16 = vand.u32 4294901760, %v2857_v20  ;;  %v818_v46 = vld [vmem:[%s4109_s5 + $0x30] sm:$0xff] }
  0x38   :  { %328 = vmatprep.subr.mxu1 %v4156_v0  ;;  %358 = vmatprep.subr.mxu0 %v4156_v0 }
  0x39   :  { %334 = vmatpush2.msra.mxu1 %v333_v41  ;;  %361 = vmatpush1.msra.mxu0 %v2850_v18  ;;  %v4178_v18 = vand.u32 4294901760, %v2860_v21 }
  0x3a   :  { %335 = vmatprep.subr.mxu1 %v4156_v0  ;;  %362 = vmatprep.subr.mxu0 %v4156_v0 }
  0x3b   :  { %341 = vmatpush2.msra.mxu1 %v340_v61  ;;  %343 = vmatprep.mubr.f32.mxu1 %v3064_v53 }
  0x3c   :  { %365 = vmatpush1.msra.mxu0 %v2857_v20  ;;  %345 = vmatmul.mubr.f32.vlgmr.msra.gmra.mxu1 %v3077_v52  ;;  %v4180_v20 = vand.u32 4294901760, %v2893_v35 }
  0x3d   :  { %366 = vmatprep.subr.mxu0 %v4156_v0  ;;  %472 = vmatprep.subr.mxu1 %v4156_v0 }
  0x3e   :  { %369 = vmatpush1.msra.mxu0 %v2860_v21  ;;  %474 = vmatpush1.msra.mxu1 %v2813_v4  ;;  %v4188_v21 = vand.u32 4294901760, %v3011_v47 }
  0x3f   :  { %370 = vmatprep.subr.mxu0 %v4156_v0  ;;  %475 = vmatprep.subr.mxu1 %v4156_v0 }
  0x40   :  { %373 = vmatpush1.msra.mxu0 %v2877_v30  ;;  %477 = vmatpush1.msra.mxu1 %v2815_v5 }
  0x41   :  { %374 = vmatprep.subr.mxu0 %v4156_v0  ;;  %478 = vmatprep.subr.mxu1 %v4156_v0 }
  0x42   :  { %377 = vmatpush1.msra.mxu0 %v2893_v35  ;;  %480 = vmatpush1.msra.mxu1 %v2817_v6  ;;  %v4193_v35 = vand.u32 4294901760, %v3092_v40 }
  0x43   :  { %378 = vmatprep.subr.mxu0 %v4156_v0  ;;  %481 = vmatprep.subr.mxu1 %v4156_v0 }
  0x44   :  { %381 = vmatpush1.msra.mxu0 %v2910_v43  ;;  %483 = vmatpush1.msra.mxu1 %v2828_v10 }
  0x45   :  { %382 = vmatprep.subr.mxu0 %v4156_v0  ;;  %484 = vmatprep.subr.mxu1 %v4156_v0 }
  0x46   :  { %385 = vmatpush1.msra.mxu0 %v2921_v48  ;;  %486 = vmatpush1.msra.mxu1 %v2830_v11 }
  0x47   :  { %386 = vmatprep.subr.mxu0 %v4156_v0  ;;  %487 = vmatprep.subr.mxu1 %v4156_v0 }
  0x48   :  { %389 = vmatpush1.msra.mxu0 %v2936_v54  ;;  %489 = vmatpush1.msra.mxu1 %v2832_v12 }
  0x49   :  { %390 = vmatprep.subr.mxu0 %v4156_v0  ;;  %490 = vmatprep.subr.mxu1 %v4156_v0 }
  0x4a   :  { %393 = vmatpush1.msra.mxu0 %v2948_v59  ;;  %492 = vmatpush1.msra.mxu1 %v2847_v17 }
  0x4b   :  { %394 = vmatprep.subr.mxu0 %v4156_v0  ;;  %493 = vmatprep.subr.mxu1 %v4156_v0 }
  0x4c   :  { %397 = vmatpush1.msra.mxu0 %v2966_v3  ;;  %495 = vmatpush1.msra.mxu1 %v2866_v25 }
  0x4d   :  { %398 = vmatprep.subr.mxu0 %v4156_v0  ;;  %496 = vmatprep.subr.mxu1 %v4156_v0 }
  0x4e   :  { %401 = vmatpush1.msra.mxu0 %v2971_v7  ;;  %498 = vmatpush1.msra.mxu1 %v2873_v28 }
  0x4f   :  { %402 = vmatprep.subr.mxu0 %v4156_v0  ;;  %499 = vmatprep.subr.mxu1 %v4156_v0 }
  0x50   :  { %405 = vmatpush1.msra.mxu0 %v2996_v37  ;;  %501 = vmatpush1.msra.mxu1 %v2896_v36 }
  0x51   :  { %406 = vmatprep.subr.mxu0 %v4156_v0  ;;  %502 = vmatprep.subr.mxu1 %v4156_v0 }
  0x52   :  { %409 = vmatpush1.msra.mxu0 %v3011_v47  ;;  %504 = vmatpush1.msra.mxu1 %v2907_v42 }
  0x53   :  { %410 = vmatprep.subr.mxu0 %v4156_v0  ;;  %505 = vmatprep.subr.mxu1 %v4156_v0 }
  0x54   :  { %413 = vmatpush1.msra.mxu0 %v3029_v62  ;;  %507 = vmatpush1.msra.mxu1 %v2925_v49 }
  0x55   :  { %430 = vmatprep.subr.mxu0 %v4156_v0  ;;  %508 = vmatprep.subr.mxu1 %v4156_v0 }
  0x56   :  { %433 = vmatpush2.msra.mxu0 %v3041_v32  ;;  %510 = vmatpush1.msra.mxu1 %v2940_v55 }
  0x57   :  { %434 = vmatprep.subr.mxu0 %v4156_v0  ;;  %511 = vmatprep.subr.mxu1 %v4156_v0 }
  0x58   :  { %437 = vmatpush2.msra.mxu0 %v3060_v14  ;;  %513 = vmatpush1.msra.mxu1 %v2952_v60 }
  0x59   :  { %438 = vmatprep.subr.mxu0 %v4156_v0  ;;  %514 = vmatprep.subr.mxu1 %v4156_v0 }
  0x5a   :  { %441 = vmatpush2.msra.mxu0 %v3075_v58  ;;  %516 = vmatpush1.msra.mxu1 %v2977_v13 }
  0x5b   :  { %442 = vmatprep.subr.mxu0 %v4156_v0  ;;  %517 = vmatprep.subr.mxu1 %v4156_v0 }
  0x5c   :  { %445 = vmatpush2.msra.mxu0 %v3092_v40  ;;  %519 = vmatpush1.msra.mxu1 %v2982_v19  ;;  %v825_v40 = vld [vmem:[%s4109_s5 + $0x68] sm:$0xff] }
  0x5d   :  { %446 = vmatprep.subr.mxu0 %v4156_v0  ;;  %536 = vmatprep.subr.mxu1 %v4156_v0 }
  0x5e   :  { %449 = vmatpush2.msra.mxu0 %v3117_v1  ;;  %538 = vmatpush2.msra.mxu1 %v3005_v44 }
  0x5f   :  { %450 = vmatprep.subr.mxu0 %v4156_v0  ;;  %539 = vmatprep.subr.mxu1 %v4156_v0 }
  0x60   :  { %453 = vmatpush2.msra.mxu0 %v3130_v51  ;;  %541 = vmatpush2.msra.mxu1 %v3015_v50 }
  0x61   :  { %454 = vmatprep.subr.mxu0 %v4156_v0  ;;  %542 = vmatprep.subr.mxu1 %v4156_v0 }
  0x62   :  { %457 = vmatpush2.msra.mxu0 %v3141_v22  ;;  %544 = vmatpush2.msra.mxu1 %v3036_v8  ;;  %v827_v22 = vld [vmem:[%s4109_s5 + $0x78] sm:$0xff] }
  0x63   :  { %458 = vmatprep.subr.mxu0 %v4156_v0  ;;  %545 = vmatprep.subr.mxu1 %v4156_v0 }
  0x64   :  { %461 = vmatpush2.msra.mxu0 %v3154_v45  ;;  %464 = vmatprep.mubr.f32.mxu0 %v3099_v39  ;;  %v4179_v39 = vand.u32 4294901760, %v2877_v30  ;;  %v4192_v30 = vand.u32 4294901760, %v3075_v58 }
  0x65   :  { %547 = vmatpush2.msra.mxu1 %v4170_v27  ;;  %467 = vmatmul.mubr.f32.vlgmr.msra.gmra.mxu0 %v3110_v24  ;;  %v4189_v24 = vand.u32 4294901760, %v3029_v62 }
  0x66   :  { %548 = vmatprep.subr.mxu1 %v4156_v0  ;;  %572 = vmatprep.subr.mxu0 %v4156_v0 }
  0x67   :  { %550 = vmatpush2.msra.mxu1 %v4171_v31  ;;  %576 = vmatpush1.msra.mxu0 %v4172_v9 }
  0x68   :  { %551 = vmatprep.subr.mxu1 %v4156_v0  ;;  %577 = vmatprep.subr.mxu0 %v4156_v0 }
  0x69   :  { %553 = vmatpush2.msra.mxu1 %v3096_v29  ;;  %581 = vmatpush1.msra.mxu0 %v4173_v56 }
  0x6a   :  { %554 = vmatprep.subr.mxu1 %v4156_v0  ;;  %582 = vmatprep.subr.mxu0 %v4156_v0 }
  0x6b   :  { %556 = vmatpush2.msra.mxu1 %v3114_v2  ;;  %586 = vmatpush1.msra.mxu0 %v4174_v33  ;;  %v3534_v33 = vand.u32 4294901760, %v819_v26 }
  0x6c   :  { %557 = vmatprep.subr.mxu1 %v4156_v0  ;;  %587 = vmatprep.subr.mxu0 %v4156_v0 }
  0x6d   :  { %559 = vmatpush2.msra.mxu1 %v3126_v23  ;;  %563 = vmatprep.mubr.f32.mxu1 %v4175_v15  ;;  %v3536_v15 = vand.u32 4294901760, %v818_v46 }
  0x6e   :  { %591 = vmatpush1.msra.mxu0 %v4176_v16  ;;  %567 = vmatmul.mubr.f32.vlgmr.msra.gmra.mxu1 %v4177_v34 }
  0x6f   :  { %592 = vmatprep.subr.mxu0 %v4156_v0  ;;  %716 = vmatprep.subr.mxu1 %v4156_v0 }
  0x70   :  { %596 = vmatpush1.msra.mxu0 %v4178_v18  ;;  %718 = vmatpush1.msra.mxu1 %v2813_v4  ;;  %v4181_v4 = vand.u32 4294901760, %v2910_v43  ;;  %v3426_v43 = vand.u32 4294901760, %v827_v22 }
  0x71   :  { %597 = vmatprep.subr.mxu0 %v4156_v0  ;;  %719 = vmatprep.subr.mxu1 %v4156_v0 }
  0x72   :  { %601 = vmatpush1.msra.mxu0 %v4179_v39  ;;  %721 = vmatpush1.msra.mxu1 %v2815_v5  ;;  %v4182_v5 = vand.u32 4294901760, %v2921_v48  ;;  %v3549_v39 = vsub.f32 %v819_v26, %v3534_v33  ;;  %v813_v26 = vld [vmem:[%s4109_s5 + $0x8] sm:$0xff] }
  0x73   :  { %602 = vmatprep.subr.mxu0 %v4156_v0  ;;  %722 = vmatprep.subr.mxu1 %v4156_v0 }
  0x74   :  { %606 = vmatpush1.msra.mxu0 %v4180_v20  ;;  %724 = vmatpush1.msra.mxu1 %v2817_v6  ;;  %v4183_v6 = vand.u32 4294901760, %v2936_v54  ;;  %v822_v54 = vld [vmem:[%s4109_s5 + $0x50] sm:$0xff]  ;;  %v3553_v20 = vsub.f32 %v818_v46, %v3536_v15 }
  0x75   :  { %607 = vmatprep.subr.mxu0 %v4156_v0  ;;  %725 = vmatprep.subr.mxu1 %v4156_v0 }
  0x76   :  { %611 = vmatpush1.msra.mxu0 %v4181_v4  ;;  %727 = vmatpush1.msra.mxu1 %v2828_v10  ;;  %v4184_v10 = vand.u32 4294901760, %v2948_v59  ;;  %v3445_v59 = vand.u32 4294901760, %v822_v54 }
  0x77   :  { %612 = vmatprep.subr.mxu0 %v4156_v0  ;;  %728 = vmatprep.subr.mxu1 %v4156_v0 }
  0x78   :  { %616 = vmatpush1.msra.mxu0 %v4182_v5  ;;  %730 = vmatpush1.msra.mxu1 %v2830_v11  ;;  %v4185_v11 = vand.u32 4294901760, %v2966_v3  ;;  %v820_v3 = vld [vmem:[%s4109_s5 + $0x40] sm:$0xff]  ;;  %v3473_v47 = vsub.f32 %v822_v54, %v3445_v59 }
  0x79   :  { %617 = vmatprep.subr.mxu0 %v4156_v0  ;;  %731 = vmatprep.subr.mxu1 %v4156_v0 }
  0x7a   :  { %621 = vmatpush1.msra.mxu0 %v4183_v6  ;;  %733 = vmatpush1.msra.mxu1 %v2832_v12  ;;  %v4186_v12 = vand.u32 4294901760, %v2971_v7  ;;  %v3454_v7 = vsub.f32 %v827_v22, %v3426_v43  ;;  %v3505_v45 = vand.u32 4294901760, %v3473_v47  ;;  %v3563_v6 = vand.u32 4294901760, %v3549_v39 }
  0x7b   :  { %622 = vmatprep.subr.mxu0 %v4156_v0  ;;  %734 = vmatprep.subr.mxu1 %v4156_v0 }
  0x7c   :  { %626 = vmatpush1.msra.mxu0 %v4184_v10  ;;  %736 = vmatpush1.msra.mxu1 %v2847_v17  ;;  %v4187_v17 = vand.u32 4294901760, %v2996_v37  ;;  %v958_v16 = vsub.f32 %v3473_v47, %v3505_v45 }
  0x7d   :  { %627 = vmatprep.subr.mxu0 %v4156_v0  ;;  %737 = vmatprep.subr.mxu1 %v4156_v0 }
  0x7e   :  { %631 = vmatpush1.msra.mxu0 %v4185_v11  ;;  %739 = vmatpush1.msra.mxu1 %v2866_v25  ;;  %v4190_v25 = vand.u32 4294901760, %v3041_v32  ;;  %v3485_v32 = vand.u32 4294901760, %v820_v3  ;;  %v3569_v10 = vand.u32 4294901760, %v958_v16 }
  0x7f   :  { %632 = vmatprep.subr.mxu0 %v4156_v0  ;;  %740 = vmatprep.subr.mxu1 %v4156_v0 }
  0x80   :  { %636 = vmatpush1.msra.mxu0 %v4186_v12  ;;  %742 = vmatpush1.msra.mxu1 %v2873_v28  ;;  %v4191_v28 = vand.u32 4294901760, %v3060_v14  ;;  %4201 = vst [vmem:[#allocation7_spill] sm:$0xff] %v3569_v10  ;;  %v3574_v12 = vand.u32 4294901760, %v3553_v20 }
  0x81   :  { %637 = vmatprep.subr.mxu0 %v4156_v0  ;;  %743 = vmatprep.subr.mxu1 %v4156_v0 }
  0x82   :  { %641 = vmatpush1.msra.mxu0 %v4187_v17  ;;  %745 = vmatpush1.msra.mxu1 %v2896_v36  ;;  %v4194_v36 = vand.u32 4294901760, %v3117_v1 }
  0x83   :  { %642 = vmatprep.subr.mxu0 %v4156_v0  ;;  %746 = vmatprep.subr.mxu1 %v4156_v0 }
  0x84   :  { %646 = vmatpush1.msra.mxu0 %v4188_v21  ;;  %748 = vmatpush1.msra.mxu1 %v2907_v42  ;;  %v4195_v42 = vand.u32 4294901760, %v3130_v51  ;;  %v979_v21 = vsub.f32 %v3549_v39, %v3563_v6 }
  0x85   :  { %647 = vmatprep.subr.mxu0 %v4156_v0  ;;  %749 = vmatprep.subr.mxu1 %v4156_v0 }
  0x86   :  { %651 = vmatpush1.msra.mxu0 %v4189_v24  ;;  %751 = vmatpush1.msra.mxu1 %v2925_v49  ;;  %v824_v49 = vld [vmem:[%s4109_s5 + $0x60] sm:$0xff] }
  0x87   :  { %668 = vmatprep.subr.mxu0 %v4156_v0  ;;  %752 = vmatprep.subr.mxu1 %v4156_v0 }
  0x88   :  { %672 = vmatpush2.msra.mxu0 %v4190_v25  ;;  %754 = vmatpush1.msra.mxu1 %v2940_v55  ;;  %v3441_v55 = vand.u32 4294901760, %v824_v49  ;;  %v986_v25 = vsub.f32 %v3553_v20, %v3574_v12 }
  0x89   :  { %673 = vmatprep.subr.mxu0 %v4156_v0  ;;  %755 = vmatprep.subr.mxu1 %v4156_v0 }
  0x8a   :  { %677 = vmatpush2.msra.mxu0 %v4191_v28  ;;  %757 = vmatpush1.msra.mxu1 %v2952_v60  ;;  %v821_v60 = vld [vmem:[%s4109_s5 + $0x48] sm:$0xff]  ;;  %v3466_v37 = vsub.f32 %v824_v49, %v3441_v55  ;;  %v3596_v28 = vand.u32 4294901760, %v979_v21 }
  0x8b   :  { %678 = vmatprep.subr.mxu0 %v4156_v0  ;;  %758 = vmatprep.subr.mxu1 %v4156_v0 }
  0x8c   :  { %682 = vmatpush2.msra.mxu0 %v4192_v30  ;;  %760 = vmatpush1.msra.mxu1 %v2977_v13  ;;  %4204 = vst [vmem:[#allocation10_spill] sm:$0xff] %v3596_v28  ;;  %v3600_v30 = vand.u32 4294901760, %v986_v25 }
  0x8d   :  { %683 = vmatprep.subr.mxu0 %v4156_v0  ;;  %761 = vmatprep.subr.mxu1 %v4156_v0 }
  0x8e   :  { %687 = vmatpush2.msra.mxu0 %v4193_v35  ;;  %763 = vmatpush1.msra.mxu1 %v2982_v19  ;;  %v3463_v19 = vand.u32 4294901760, %v821_v60  ;;  %4205 = vst [vmem:[#allocation11_spill] sm:$0xff] %v3600_v30  ;;  %v817_v35 = vld [vmem:[%s4109_s5 + $0x28] sm:$0xff] }
  0x8f   :  { %688 = vmatprep.subr.mxu0 %v4156_v0  ;;  %780 = vmatprep.subr.mxu1 %v4156_v0 }
  0x90   :  { %692 = vmatpush2.msra.mxu0 %v4194_v36  ;;  %782 = vmatpush2.msra.mxu1 %v3005_v44  ;;  %v3610_v36 = vand.u32 4294901760, %v817_v35 }
  0x91   :  { %693 = vmatprep.subr.mxu0 %v4156_v0  ;;  %783 = vmatprep.subr.mxu1 %v4156_v0 }
  0x92   :  { %697 = vmatpush2.msra.mxu0 %v4195_v42  ;;  %785 = vmatpush2.msra.mxu1 %v3015_v50  ;;  %v3476_v50 = vand.u32 4294901760, %v3454_v7  ;;  %v816_v42 = vld [vmem:[%s4109_s5 + $0x20] sm:$0xff]  ;;  %v3616_v22 = vsub.f32 %v817_v35, %v3610_v36 }
  0x93   :  { %698 = vmatprep.subr.mxu0 %v4156_v0  ;;  %786 = vmatprep.subr.mxu1 %v4156_v0 }
  0x94   :  { %702 = vmatpush2.msra.mxu0 %v331_v38  ;;  %788 = vmatpush2.msra.mxu1 %v3036_v8  ;;  %v3626_v49 = vand.u32 4294901760, %v3616_v22 }
  0x95   :  { %703 = vmatprep.subr.mxu0 %v4156_v0  ;;  %789 = vmatprep.subr.mxu1 %v4156_v0 }
  0x96   :  { %707 = vmatpush2.msra.mxu0 %v338_v63  ;;  %709 = vmatprep.mubr.f32.mxu0 %v3064_v53  ;;  %v3492_v63 = vsub.f32 %v821_v60, %v3463_v19  ;;  %v814_v60 = vld [vmem:[%s4109_s5 + $0x10] sm:$0xff] }
  0x97   :  { %791 = vmatpush2.msra.mxu1 %v4170_v27  ;;  %711 = vmatmul.mubr.f32.vlgmr.msra.gmra.mxu0 %v3077_v52  ;;  %v3522_v27 = vsub.f32 %v820_v3, %v3485_v32  ;;  %v993_v3 = vsub.f32 %v3616_v22, %v3626_v49 }
  0x98   :  { %792 = vmatprep.subr.mxu1 %v4156_v0  ;;  %805 = vmatprep.mubr.f32.mxu1 %v3064_v53  ;;  %v3488_v53 = vand.u32 4294901760, %v3466_v37 }
  0x99   :  { %794 = vmatpush2.msra.mxu1 %v4171_v31  ;;  %2341 = vmatprep.subr.mxu0 %v4156_v0  ;;  %v3525_v31 = vand.u32 4294901760, %v3492_v63  ;;  %v3546_v18 = vand.u32 4294901760, %v3522_v27  ;;  %v3653_v46 = vand.u32 4294901760, %v993_v3 }
  0x9a   :  { %795 = vmatprep.subr.mxu1 %v4156_v0  ;;  %2342 = vmatpush3.msra.mxu0 %v3426_v43  ;;  %v944_v61 = vsub.f32 %v3466_v37, %v3488_v53 }
  0x9b   :  { %797 = vmatpush2.msra.mxu1 %v3096_v29  ;;  %v826_v29 = vld [vmem:[%s4109_s5 + $0x70] sm:$0xff]  ;;  %2343 = vmatprep.subr.mxu0 %v4156_v0  ;;  %v965_v5 = vsub.f32 %v3492_v63, %v3525_v31  ;;  %v972_v11 = vsub.f32 %v3522_v27, %v3546_v18  ;;  %4206 = vst [vmem:[#allocation12_spill] sm:$0xff] %v3653_v46 }
  0x9c   :  { %798 = vmatprep.subr.mxu1 %v4156_v0  ;;  %v3428_v48 = vand.u32 4294901760, %v826_v29  ;;  %v3543_v34 = vand.u32 4294901760, %v944_v61  ;;  %2373 = vmatprep.mubr.msk.f32.mxu0 %vm2766_vm1, %v4156_v0 }
  0x9d   :  { %800 = vmatpush2.msra.mxu1 %v3114_v2  ;;  %v923_v2 = vsub.f32 %v3454_v7, %v3476_v50  ;;  %v3580_v17 = vand.u32 4294901760, %v965_v5  ;;  %v3588_v24 = vand.u32 4294901760, %v972_v11  ;;  %v3664_v5 = vand.u32 4294901760, %v813_v26  ;;  %v812_v11 = vld [vmem:[%s4109_s5] sm:$0xff] }
  0x9e   :  { %801 = vmatprep.subr.mxu1 %v4156_v0  ;;  %v3457_v13 = vsub.f32 %v826_v29, %v3428_v48  ;;  %2344 = vmatpush3.msra.mxu0 %v3428_v48  ;;  %4199 = vst [vmem:[#allocation5_spill] sm:$0xff] %v3543_v34  ;;  %v3618_v29 = vand.u32 4294901760, %v816_v42 }
  0x9f   :  { %803 = vmatpush2.msra.mxu1 %v3126_v23  ;;  %v3430_v23 = vand.u32 4294901760, %v825_v40  ;;  %2345 = vmatprep.subr.mxu0 %v4156_v0  ;;  %v3514_v57 = vand.u32 4294901760, %v923_v2  ;;  %4202 = vst [vmem:[#allocation8_spill] sm:$0xff] %v3580_v17  ;;  %4203 = vst [vmem:[#allocation9_spill] sm:$0xff] %v3588_v24 }
  0xa0   :  { %807 = vmatmul.mubr.f32.vlgmr.msra.gmra.mxu1 %v3077_v52  ;;  %2376 = vmatprep.subr.mxu1 %v4156_v0  ;;  %v823_v52 = vld [vmem:[%s4109_s5 + $0x58] sm:$0xff]  ;;  %v3479_v62 = vand.u32 4294901760, %v3457_v13 }
  0xa1   :  { %v3443_v58 = vand.u32 4294901760, %v823_v52  ;;  %v3460_v14 = vsub.f32 %v825_v40, %v3430_v23  ;;  %2346 = vmatpush3.msra.mxu0 %v3430_v23  ;;  %4196 = vst [vmem:[#allocation2_spill] sm:$0xff] %v3514_v57  ;;  %2377 = vmatpush3.msra.mxu1 %v3514_v57  ;;  %v815_v40 = vld [vmem:[%s4109_s5 + $0x18] sm:$0xff] }
  0xa2   :  { %v930_v1 = vsub.f32 %v3457_v13, %v3479_v62  ;;  %2347 = vmatprep.subr.mxu0 %v4156_v0  ;;  %2378 = vmatprep.subr.mxu1 %v4156_v0  ;;  %v3631_v54 = vand.u32 4294901760, %v815_v40 }
  0xa3   :  { %v3469_v44 = vsub.f32 %v823_v52, %v3443_v58  ;;  %v3482_v8 = vand.u32 4294901760, %v3460_v14  ;;  %2348 = vmatpush3.msra.mxu0 %v3441_v55  ;;  %v3629_v52 = vsub.f32 %v816_v42, %v3618_v29  ;;  %v3678_v42 = vand.u32 4294901760, %v812_v11  ;;  %2408 = vmatprep.mubr.msk.f32.mxu1 %vm2766_vm1, %v4156_v0 }
  0xa4   :  { %v3516_v41 = vand.u32 4294901760, %v930_v1  ;;  %2349 = vmatprep.subr.mxu0 %v4156_v0  ;;  %v3644_v1 = vsub.f32 %v815_v40, %v3631_v54  ;;  %v3682_v40 = vsub.f32 %v813_v26, %v3664_v5 }
  0xa5   :  { %v937_v38 = vsub.f32 %v3460_v14, %v3482_v8  ;;  %v3501_v51 = vand.u32 4294901760, %v3469_v44  ;;  %2350 = vmatpush3.msra.mxu0 %v3443_v58  ;;  %v3641_v2 = vand.u32 4294901760, %v3629_v52 }
  0xa6   :  { %4197 = vst [vmem:[#allocation3_spill] sm:$0xff] %v3516_v41  ;;  %2351 = vmatprep.subr.mxu0 %v4156_v0  ;;  %2379 = vmatpush3.msra.mxu1 %v3516_v41 }
  0xa7   :  { %v3529_v9 = vand.u32 4294901760, %v937_v38  ;;  %v951_v56 = vsub.f32 %v3469_v44, %v3501_v51  ;;  %2352 = vmatpush3.msra.mxu0 %v3445_v59  ;;  %2380 = vmatprep.subr.mxu1 %v4156_v0  ;;  %v3646_v38 = vand.u32 4294901760, %v814_v60  ;;  %v1000_v61 = vsub.f32 %v3629_v52, %v3641_v2 }
  0xa8   :  { %2353 = vmatprep.subr.mxu0 %v4156_v0 }
  0xa9   :  { %4198 = vst [vmem:[#allocation4_spill] sm:$0xff] %v3529_v9  ;;  %2381 = vmatpush3.msra.mxu1 %v3529_v9  ;;  %v3558_v4 = vand.u32 4294901760, %v951_v56  ;;  %2354 = vmatpush3.msra.mxu0 %v3463_v19  ;;  %v3658_v56 = vand.u32 4294901760, %v3644_v1  ;;  %v3661_v16 = vsub.f32 %v814_v60, %v3646_v38  ;;  %v3671_v21 = vand.u32 4294901760, %v1000_v61 }
  0xaa   :  { %2382 = vmatprep.subr.mxu1 %v4156_v0  ;;  %2355 = vmatprep.subr.mxu0 %v4156_v0  ;;  %v3691_v61 = vsub.f32 %v812_v11, %v3678_v42 }
  0xab   :  { %4200 = vst [vmem:[#allocation6_spill] sm:$0xff] %v3558_v4  ;;  %2383 = vmatpush3.msra.mxu1 %v3543_v34  ;;  %2356 = vmatpush3.msra.mxu0 %v3485_v32  ;;  %4207 = vst [vmem:[#allocation13_spill] sm:$0xff] %v3658_v56  ;;  %v1007_v25 = vsub.f32 %v3644_v1, %v3658_v56  ;;  %v3676_v35 = vand.u32 4294901760, %v3661_v16 }
  0xac   :  { %2384 = vmatprep.subr.mxu1 %v4156_v0  ;;  %2357 = vmatprep.subr.mxu0 %v4156_v0  ;;  %4208 = vst [vmem:[#allocation14_spill] sm:$0xff] %v3671_v21 }
  0xad   :  { %2385 = vmatpush3.msra.mxu1 %v3558_v4  ;;  %2358 = vmatpush3.msra.mxu0 %v3534_v33  ;;  %4209 = vst [vmem:[#allocation15_spill] sm:$0xff] %v3676_v35  ;;  %v3686_v60 = vand.u32 4294901760, %v1007_v25  ;;  %v1014_v3 = vsub.f32 %v3661_v16, %v3676_v35  ;;  %v3703_v25 = vand.u32 4294901760, %v3691_v61 }
  0xae   :  { %2386 = vmatprep.subr.mxu1 %v4156_v0  ;;  %2359 = vmatprep.subr.mxu0 %v4156_v0 }
  0xaf   :  { %2387 = vmatpush3.msra.mxu1 %v3569_v10  ;;  %2360 = vmatpush3.msra.mxu0 %v3536_v15  ;;  %4210 = vst [vmem:[#allocation16_spill] sm:$0xff] %v3686_v60  ;;  %v3700_v26 = vand.u32 4294901760, %v1014_v3  ;;  %4213 = vst [vmem:[#allocation19_spill] sm:$0xff] %v3703_v25 }
  0xb0   :  { %2388 = vmatprep.subr.mxu1 %v4156_v0  ;;  %2361 = vmatprep.subr.mxu0 %v4156_v0 }
  0xb1   :  { %2389 = vmatpush3.msra.mxu1 %v3580_v17  ;;  %2362 = vmatpush3.msra.mxu0 %v3610_v36  ;;  %4212 = vst [vmem:[#allocation18_spill] sm:$0xff] %v3700_v26 }
  0xb2   :  { %2390 = vmatprep.subr.mxu1 %v4156_v0  ;;  %2363 = vmatprep.subr.mxu0 %v4156_v0 }
  0xb3   :  { %2391 = vmatpush3.msra.mxu1 %v3588_v24  ;;  %2364 = vmatpush3.msra.mxu0 %v3618_v29 }
  0xb4   :  { %2392 = vmatprep.subr.mxu1 %v4156_v0  ;;  %2365 = vmatprep.subr.mxu0 %v4156_v0 }
  0xb5   :  { %2393 = vmatpush3.msra.mxu1 %v3596_v28  ;;  %2366 = vmatpush3.msra.mxu0 %v3631_v54 }
  0xb6   :  { %2394 = vmatprep.subr.mxu1 %v4156_v0  ;;  %2367 = vmatprep.subr.mxu0 %v4156_v0 }
  0xb7   :  { %2395 = vmatpush3.msra.mxu1 %v3600_v30  ;;  %2368 = vmatpush3.msra.mxu0 %v3646_v38 }
  0xb8   :  { %2396 = vmatprep.subr.mxu1 %v4156_v0  ;;  %2369 = vmatprep.subr.mxu0 %v4156_v0 }
  0xb9   :  { %2397 = vmatpush3.msra.mxu1 %v3653_v46  ;;  %2370 = vmatpush3.msra.mxu0 %v3664_v5  ;;  %v3696_v46 = vand.u32 4294901760, %v3682_v40 }
  0xba   :  { %2398 = vmatprep.subr.mxu1 %v4156_v0  ;;  %2371 = vmatprep.subr.mxu0 %v4156_v0 }
  0xbb   :  { %2399 = vmatpush3.msra.mxu1 %v3671_v21  ;;  %4211 = vst [vmem:[#allocation17_spill] sm:$0xff] %v3696_v46  ;;  %2372 = vmatpush3.msra.mxu0 %v3678_v42  ;;  %v1021_v11 = vsub.f32 %v3682_v40, %v3696_v46  ;;  %v1028_v21 = vsub.f32 %v3691_v61, %v3703_v25 }
  0xbc   :  { %2400 = vmatprep.subr.mxu1 %v4156_v0  ;;  %2411 = vmatprep.subr.mxu0 %v4156_v0 }
  0xbd   :  { %2401 = vmatpush3.msra.mxu1 %v3686_v60  ;;  %v3713_v60 = vand.u32 4294901760, %v1021_v11  ;;  %v3715_v3 = vand.u32 4294901760, %v1028_v21  ;;  %v49_v21 = vld [vmem:[%s4110_s2] sm:$0xff] }
  0xbe   :  { %2402 = vmatprep.subr.mxu1 %v4156_v0 }
  0xbf   :  { %2403 = vmatpush3.msra.mxu1 %v3700_v26  ;;  %4214 = vst [vmem:[#allocation20_spill] sm:$0xff] %v3713_v60  ;;  %4215 = vst [vmem:[#allocation21_spill] sm:$0xff] %v3715_v3 }
  0xc0   :  { %2404 = vmatprep.subr.mxu1 %v4156_v0 }
  0xc1   :  { %2405 = vmatpush3.msra.mxu1 %v3713_v60 }
  0xc2   :  { %2406 = vmatprep.subr.mxu1 %v4156_v0 }
  0xc3   :  { %2407 = vmatpush3.msra.mxu1 %v3715_v3 }
  0xc4   :  { %2446 = vmatprep.subr.mxu1 %v4156_v0 }
  0xf4   :  { %v154_v26 = vpop.f32.mrf.mxu0 }
  0xf5   :  { %v155_v60 = vadd.f32 %v154_v26, %v49_v21  ;;  %v4225_v26 = vld [vmem:[#allocation6_spill] sm:$0xff] }
  0xf6   :  { %v156_v11 = vpop.f32.mrf.mxu0  ;;  %v4229_v21 = vld [vmem:[#allocation10_spill] sm:$0xff] }
  0xf7   :  { %v4230_v11 = vld [vmem:[#allocation11_spill] sm:$0xff] }
  0xfc   :  { %v346_v30 = vpop.f32.mrf.mxu1 }
  0xfd   :  { %v347_v28 = vadd.f32 %v346_v30, %v155_v60  ;;  %v4224_v60 = vld [vmem:[#allocation5_spill] sm:$0xff] }
  0xfe   :  { %v348_v24 = vpop.f32.mrf.mxu1 }
  0xff   :  { %v4220_v24 = vld [vmem:[#allocation17_spill] sm:$0xff] }
 0x125   :  { %v468_v3 = vpop.f32.mrf.mxu0 }
 0x126   :  { %v469_v25 = vadd.f32 %v468_v3, %v347_v28  ;;  %v4221_v28 = vld [vmem:[#allocation3_spill] sm:$0xff]  ;;  %v4228_v3 = vld [vmem:[#allocation9_spill] sm:$0xff] }
 0x127   :  { %v470_v17 = vpop.f32.mrf.mxu0 }
 0x128   :  { %v4219_v17 = vld [vmem:[#allocation2_spill] sm:$0xff] }
 0x12e   :  { %v568_v10 = vpop.f32.mrf.mxu1 }
 0x12f   :  { %v569_v41 = vadd.f32 %v568_v10, %v469_v25  ;;  %v4218_v10 = vld [vmem:[#allocation15_spill] sm:$0xff] }
 0x130   :  { %v570_v4 = vpop.f32.mrf.mxu1  ;;  %v4226_v25 = vld [vmem:[#allocation7_spill] sm:$0xff] }
 0x131   :  { %v4216_v4 = vmov 0.0  }
 0x157   :  { %v712_v34 = vpop.f32.mrf.mxu0 }
 0x158   :  { %v713_v46 = vadd.f32 %v712_v34, %v569_v41  ;;  %v4217_v34 = vld [vmem:[#allocation13_spill] sm:$0xff] }
 0x159   :  { %v714_v9 = vpop.f32.mrf.mxu0 }
 0x160   :  { %v808_v0 = vpop.f32.mrf.mxu1 }
 0x161   :  { %v3728_v57 = vadd.f32 %v808_v0, %v713_v46  ;;  %v4222_v46 = vld [vmem:[#allocation19_spill] sm:$0xff] }
 0x162   :  { %v810_v35 = vpop.f32.mrf.mxu1 }
 0x163   :  { %v3731_v56 = vand.u32 4294901760, %v3728_v57  ;;  %v4223_v35 = vld [vmem:[#allocation4_spill] sm:$0xff] }
 0x165   :  { %v3735_v30 = vsub.f32 %v3728_v57, %v3731_v56  ;;  %2409 = vmatmul.mubr.f32.vlgmr.msra.gmra.mxu1 %v3731_v56 }
 0x166   :  { %2447 = vmatpush3.msra.mxu1 %v3426_v43  ;;  %2478 = vmatprep.mubr.msk.f32.mxu1 %vm2766_vm1, %v4216_v4 }
 0x167   :  { %v911_v41 = vand.u32 4294901760, %v3735_v30  ;;  %2448 = vmatprep.subr.mxu1 %v4216_v4 }
 0x168   :  { %2449 = vmatpush3.msra.mxu1 %v3428_v48 }
 0x169   :  { %2450 = vmatprep.subr.mxu1 %v4216_v4  ;;  %v912_v0 = vsub.f32 %v3735_v30, %v911_v41 }
 0x16a   :  { %2451 = vmatpush3.msra.mxu1 %v3430_v23 }
 0x16b   :  { %2452 = vmatprep.subr.mxu1 %v4216_v4  ;;  %v913_v9 = vand.u32 4294901760, %v912_v0  ;;  %v4233_v0 = vld [vmem:[#allocation16_spill] sm:$0xff] }
 0x16c   :  { %2453 = vmatpush3.msra.mxu1 %v3441_v55 }
 0x16d   :  { %2454 = vmatprep.subr.mxu1 %v4216_v4  ;;  %2374 = vmatmul.mubr.f32.vlgmr.msra.gmra.mxu0 %v913_v9  ;;  %v4234_v9 = vld [vmem:[#allocation18_spill] sm:$0xff] }
 0x16e   :  { %2412 = vmatpush3.msra.mxu0 %v3454_v7  ;;  %2455 = vmatpush3.msra.mxu1 %v3443_v58 }
 0x16f   :  { %2413 = vmatprep.subr.mxu0 %v4216_v4  ;;  %2456 = vmatprep.subr.mxu1 %v4216_v4 }
 0x170   :  { %2414 = vmatpush3.msra.mxu0 %v3457_v13  ;;  %2457 = vmatpush3.msra.mxu1 %v3445_v59 }
 0x171   :  { %2415 = vmatprep.subr.mxu0 %v4216_v4  ;;  %2458 = vmatprep.subr.mxu1 %v4216_v4 }
 0x172   :  { %2416 = vmatpush3.msra.mxu0 %v3460_v14  ;;  %2459 = vmatpush3.msra.mxu1 %v3463_v19 }
 0x173   :  { %2417 = vmatprep.subr.mxu0 %v4216_v4  ;;  %2460 = vmatprep.subr.mxu1 %v4216_v4 }
 0x174   :  { %2418 = vmatpush3.msra.mxu0 %v3466_v37  ;;  %2461 = vmatpush3.msra.mxu1 %v3485_v32 }
 0x175   :  { %2419 = vmatprep.subr.mxu0 %v4216_v4  ;;  %2462 = vmatprep.subr.mxu1 %v4216_v4 }
 0x176   :  { %2420 = vmatpush3.msra.mxu0 %v3469_v44  ;;  %2463 = vmatpush3.msra.mxu1 %v3534_v33 }
 0x177   :  { %2421 = vmatprep.subr.mxu0 %v4216_v4  ;;  %2464 = vmatprep.subr.mxu1 %v4216_v4 }
 0x178   :  { %2422 = vmatpush3.msra.mxu0 %v3473_v47  ;;  %2465 = vmatpush3.msra.mxu1 %v3536_v15 }
 0x179   :  { %2423 = vmatprep.subr.mxu0 %v4216_v4  ;;  %2466 = vmatprep.subr.mxu1 %v4216_v4 }
 0x17a   :  { %2424 = vmatpush3.msra.mxu0 %v3492_v63  ;;  %2467 = vmatpush3.msra.mxu1 %v3610_v36 }
 0x17b   :  { %2425 = vmatprep.subr.mxu0 %v4216_v4  ;;  %2468 = vmatprep.subr.mxu1 %v4216_v4 }
 0x17c   :  { %2426 = vmatpush3.msra.mxu0 %v3522_v27  ;;  %2469 = vmatpush3.msra.mxu1 %v3618_v29 }
 0x17d   :  { %2427 = vmatprep.subr.mxu0 %v4216_v4  ;;  %2470 = vmatprep.subr.mxu1 %v4216_v4 }
 0x17e   :  { %2428 = vmatpush3.msra.mxu0 %v3549_v39  ;;  %2471 = vmatpush3.msra.mxu1 %v3631_v54 }
 0x17f   :  { %2429 = vmatprep.subr.mxu0 %v4216_v4  ;;  %2472 = vmatprep.subr.mxu1 %v4216_v4 }
 0x180   :  { %2430 = vmatpush3.msra.mxu0 %v3553_v20  ;;  %2473 = vmatpush3.msra.mxu1 %v3646_v38 }
 0x181   :  { %2431 = vmatprep.subr.mxu0 %v4216_v4  ;;  %2474 = vmatprep.subr.mxu1 %v4216_v4 }
 0x182   :  { %2432 = vmatpush3.msra.mxu0 %v3616_v22  ;;  %2475 = vmatpush3.msra.mxu1 %v3664_v5 }
 0x183   :  { %2433 = vmatprep.subr.mxu0 %v4216_v4  ;;  %2476 = vmatprep.subr.mxu1 %v4216_v4 }
 0x184   :  { %2434 = vmatpush3.msra.mxu0 %v3629_v52  ;;  %2477 = vmatpush3.msra.mxu1 %v3678_v42 }
 0x185   :  { %2435 = vmatprep.subr.mxu0 %v4216_v4  ;;  %2479 = vmatmul.mubr.f32.vlgmr.msra.gmra.mxu1 %v911_v41  ;;  %v4232_v41 = vld [vmem:[#allocation14_spill] sm:$0xff] }
 0x186   :  { %2516 = vmatprep.subr.mxu1 %v4216_v4  ;;  %2436 = vmatpush3.msra.mxu0 %v3644_v1 }
 0x187   :  { %2517 = vmatpush3.msra.mxu1 %v3426_v43  ;;  %2437 = vmatprep.subr.mxu0 %v4216_v4 }
 0x188   :  { %2518 = vmatprep.subr.mxu1 %v4216_v4  ;;  %2438 = vmatpush3.msra.mxu0 %v3661_v16 }
 0x189   :  { %2519 = vmatpush3.msra.mxu1 %v3428_v48  ;;  %2439 = vmatprep.subr.mxu0 %v4216_v4 }
 0x18a   :  { %2520 = vmatprep.subr.mxu1 %v4216_v4  ;;  %2440 = vmatpush3.msra.mxu0 %v3682_v40 }
 0x18b   :  { %2521 = vmatpush3.msra.mxu1 %v3430_v23  ;;  %2441 = vmatprep.subr.mxu0 %v4216_v4 }
 0x18c   :  { %2522 = vmatprep.subr.mxu1 %v4216_v4  ;;  %2442 = vmatpush3.msra.mxu0 %v3691_v61 }
 0x18d   :  { %2443 = vmatprep.mubr.msk.f32.mxu0 %vm2766_vm1, %v4216_v4  ;;  %2523 = vmatpush3.msra.mxu1 %v3441_v55 }
 0x18e   :  { %2444 = vmatmul.mubr.f32.vlgmr.msra.gmra.mxu0 %v3735_v30  ;;  %2481 = vmatprep.subr.mxu0 %v4216_v4  ;;  %v4231_v30 = vld [vmem:[#allocation12_spill] sm:$0xff] }
 0x18f   :  { %2524 = vmatprep.subr.mxu1 %v4216_v4  ;;  %2482 = vmatpush3.msra.mxu0 %v3476_v50 }
 0x190   :  { %2525 = vmatpush3.msra.mxu1 %v3443_v58  ;;  %2483 = vmatprep.subr.mxu0 %v4216_v4 }
 0x191   :  { %2526 = vmatprep.subr.mxu1 %v4216_v4  ;;  %2484 = vmatpush3.msra.mxu0 %v3479_v62 }
 0x192   :  { %2527 = vmatpush3.msra.mxu1 %v3445_v59  ;;  %2485 = vmatprep.subr.mxu0 %v4216_v4 }
 0x193   :  { %2528 = vmatprep.subr.mxu1 %v4216_v4  ;;  %2486 = vmatpush3.msra.mxu0 %v3482_v8 }
 0x194   :  { %2529 = vmatpush3.msra.mxu1 %v3463_v19  ;;  %2487 = vmatprep.subr.mxu0 %v4216_v4 }
 0x195   :  { %2530 = vmatprep.subr.mxu1 %v4216_v4  ;;  %2488 = vmatpush3.msra.mxu0 %v3488_v53 }
 0x196   :  { %2531 = vmatpush3.msra.mxu1 %v3485_v32  ;;  %2489 = vmatprep.subr.mxu0 %v4216_v4 }
 0x197   :  { %2532 = vmatprep.subr.mxu1 %v4216_v4  ;;  %2490 = vmatpush3.msra.mxu0 %v3501_v51 }
 0x198   :  { %2533 = vmatpush3.msra.mxu1 %v3534_v33  ;;  %2491 = vmatprep.subr.mxu0 %v4216_v4 }
 0x199   :  { %2534 = vmatprep.subr.mxu1 %v4216_v4  ;;  %2492 = vmatpush3.msra.mxu0 %v3505_v45 }
 0x19a   :  { %2535 = vmatpush3.msra.mxu1 %v3536_v15  ;;  %2493 = vmatprep.subr.mxu0 %v4216_v4 }
 0x19b   :  { %2536 = vmatprep.subr.mxu1 %v4216_v4  ;;  %2494 = vmatpush3.msra.mxu0 %v3525_v31 }
 0x19c   :  { %2537 = vmatpush3.msra.mxu1 %v3610_v36  ;;  %2495 = vmatprep.subr.mxu0 %v4216_v4 }
 0x19d   :  { %2538 = vmatprep.subr.mxu1 %v4216_v4  ;;  %2496 = vmatpush3.msra.mxu0 %v3546_v18 }
 0x19e   :  { %2539 = vmatpush3.msra.mxu1 %v3618_v29  ;;  %2497 = vmatprep.subr.mxu0 %v4216_v4 }
 0x19f   :  { %2540 = vmatprep.subr.mxu1 %v4216_v4  ;;  %2498 = vmatpush3.msra.mxu0 %v3563_v6 }
 0x1a0   :  { %2541 = vmatpush3.msra.mxu1 %v3631_v54  ;;  %2499 = vmatprep.subr.mxu0 %v4216_v4 }
 0x1a1   :  { %2542 = vmatprep.subr.mxu1 %v4216_v4  ;;  %2500 = vmatpush3.msra.mxu0 %v3574_v12 }
 0x1a2   :  { %2543 = vmatpush3.msra.mxu1 %v3646_v38  ;;  %2501 = vmatprep.subr.mxu0 %v4216_v4 }
 0x1a3   :  { %2544 = vmatprep.subr.mxu1 %v4216_v4  ;;  %2502 = vmatpush3.msra.mxu0 %v3626_v49 }
 0x1a4   :  { %2545 = vmatpush3.msra.mxu1 %v3664_v5  ;;  %2503 = vmatprep.subr.mxu0 %v4216_v4 }
 0x1a5   :  { %2546 = vmatprep.subr.mxu1 %v4216_v4  ;;  %2504 = vmatpush3.msra.mxu0 %v3641_v2 }
 0x1a6   :  { %2547 = vmatpush3.msra.mxu1 %v3678_v42  ;;  %2548 = vmatprep.mubr.msk.f32.mxu1 %vm2766_vm1, %v4216_v4 }
 0x1a7   :  { %2505 = vmatprep.subr.mxu0 %v4216_v4  ;;  %2549 = vmatmul.mubr.f32.vlgmr.msra.gmra.mxu1 %v3731_v56 }
 0x1a8   :  { %2506 = vmatpush3.msra.mxu0 %v4217_v34  ;;  %2513 = vmatprep.mubr.msk.f32.mxu0 %vm2766_vm1, %v4216_v4 }
 0x1a9   :  { %2507 = vmatprep.subr.mxu0 %v4216_v4  ;;  %2586 = vmatprep.subr.mxu1 %v4216_v4 }
 0x1aa   :  { %2508 = vmatpush3.msra.mxu0 %v4218_v10  ;;  %2587 = vmatpush3.msra.mxu1 %v4219_v17  ;;  %v4235_v17 = vld [vmem:[#allocation20_spill] sm:$0xff] }
 0x1ab   :  { %2509 = vmatprep.subr.mxu0 %v4216_v4  ;;  %2588 = vmatprep.subr.mxu1 %v4216_v4 }
 0x1ac   :  { %2510 = vmatpush3.msra.mxu0 %v4220_v24  ;;  %2589 = vmatpush3.msra.mxu1 %v4221_v28  ;;  %v4236_v28 = vld [vmem:[#allocation21_spill] sm:$0xff] }
 0x1ad   :  { %2511 = vmatprep.subr.mxu0 %v4216_v4  ;;  %2590 = vmatprep.subr.mxu1 %v4216_v4 }
 0x1ae   :  { %2512 = vmatpush3.msra.mxu0 %v4222_v46  ;;  %2591 = vmatpush3.msra.mxu1 %v4223_v35 }
 0x1af   :  { %2514 = vmatmul.mubr.f32.vlgmr.msra.gmra.mxu0 %v3731_v56  ;;  %2592 = vmatprep.subr.mxu1 %v4216_v4  ;;  %v4227_v56 = vld [vmem:[#allocation8_spill] sm:$0xff] }
 0x1b0   :  { %2593 = vmatpush3.msra.mxu1 %v4224_v60  ;;  %2551 = vmatprep.subr.mxu0 %v4216_v4 }
 0x1b1   :  { %2594 = vmatprep.subr.mxu1 %v4216_v4  ;;  %2552 = vmatpush3.msra.mxu0 %v3426_v43 }
 0x1b2   :  { %2595 = vmatpush3.msra.mxu1 %v4225_v26  ;;  %2553 = vmatprep.subr.mxu0 %v4216_v4 }
 0x1b3   :  { %2596 = vmatprep.subr.mxu1 %v4216_v4  ;;  %2554 = vmatpush3.msra.mxu0 %v3428_v48 }
 0x1b4   :  { %2597 = vmatpush3.msra.mxu1 %v4226_v25  ;;  %2555 = vmatprep.subr.mxu0 %v4216_v4 }
 0x1b5   :  { %2598 = vmatprep.subr.mxu1 %v4216_v4  ;;  %2556 = vmatpush3.msra.mxu0 %v3430_v23 }
 0x1b6   :  { %2599 = vmatpush3.msra.mxu1 %v4227_v56  ;;  %2557 = vmatprep.subr.mxu0 %v4216_v4 }
 0x1b7   :  { %2600 = vmatprep.subr.mxu1 %v4216_v4  ;;  %2558 = vmatpush3.msra.mxu0 %v3441_v55 }
 0x1b8   :  { %2601 = vmatpush3.msra.mxu1 %v4228_v3  ;;  %2559 = vmatprep.subr.mxu0 %v4216_v4 }
 0x1b9   :  { %2602 = vmatprep.subr.mxu1 %v4216_v4  ;;  %2560 = vmatpush3.msra.mxu0 %v3443_v58 }
 0x1ba   :  { %2603 = vmatpush3.msra.mxu1 %v4229_v21  ;;  %2561 = vmatprep.subr.mxu0 %v4216_v4 }
 0x1bb   :  { %2604 = vmatprep.subr.mxu1 %v4216_v4  ;;  %2562 = vmatpush3.msra.mxu0 %v3445_v59 }
 0x1bc   :  { %2605 = vmatpush3.msra.mxu1 %v4230_v11  ;;  %2563 = vmatprep.subr.mxu0 %v4216_v4 }
 0x1bd   :  { %2606 = vmatprep.subr.mxu1 %v4216_v4  ;;  %2564 = vmatpush3.msra.mxu0 %v3463_v19 }
 0x1be   :  { %2607 = vmatpush3.msra.mxu1 %v4231_v30  ;;  %2565 = vmatprep.subr.mxu0 %v4216_v4 }
 0x1bf   :  { %2608 = vmatprep.subr.mxu1 %v4216_v4  ;;  %2566 = vmatpush3.msra.mxu0 %v3485_v32 }
 0x1c0   :  { %2609 = vmatpush3.msra.mxu1 %v4232_v41  ;;  %2567 = vmatprep.subr.mxu0 %v4216_v4 }
 0x1c1   :  { %2610 = vmatprep.subr.mxu1 %v4216_v4  ;;  %2568 = vmatpush3.msra.mxu0 %v3534_v33 }
 0x1c2   :  { %2611 = vmatpush3.msra.mxu1 %v4233_v0  ;;  %2569 = vmatprep.subr.mxu0 %v4216_v4 }
 0x1c3   :  { %2612 = vmatprep.subr.mxu1 %v4216_v4  ;;  %2570 = vmatpush3.msra.mxu0 %v3536_v15 }
 0x1c4   :  { %2613 = vmatpush3.msra.mxu1 %v4234_v9  ;;  %2571 = vmatprep.subr.mxu0 %v4216_v4 }
 0x1c5   :  { %2614 = vmatprep.subr.mxu1 %v4216_v4  ;;  %2572 = vmatpush3.msra.mxu0 %v3610_v36 }
 0x1c6   :  { %2615 = vmatpush3.msra.mxu1 %v4235_v17  ;;  %2573 = vmatprep.subr.mxu0 %v4216_v4 }
 0x1c7   :  { %2616 = vmatprep.subr.mxu1 %v4216_v4  ;;  %2574 = vmatpush3.msra.mxu0 %v3618_v29 }
 0x1c8   :  { %2617 = vmatpush3.msra.mxu1 %v4236_v28  ;;  %2575 = vmatprep.subr.mxu0 %v4216_v4 }
 0x1c9   :  { %2618 = vmatprep.mubr.msk.f32.mxu1 %vm2766_vm1, %v4216_v4  ;;  %2656 = vmatprep.subr.mxu1 %v4216_v4 }
 0x1ca   :  { %2576 = vmatpush3.msra.mxu0 %v3631_v54  ;;  %2583 = vmatprep.mubr.msk.f32.mxu0 %vm2766_vm1, %v4216_v4 }
 0x1cb   :  { %2577 = vmatprep.subr.mxu0 %v4216_v4 }
 0x1cc   :  { %2578 = vmatpush3.msra.mxu0 %v3646_v38 }
 0x1cd   :  { %2579 = vmatprep.subr.mxu0 %v4216_v4 }
 0x1ce   :  { %2580 = vmatpush3.msra.mxu0 %v3664_v5 }
 0x1cf   :  { %2581 = vmatprep.subr.mxu0 %v4216_v4 }
 0x1d0   :  { %2582 = vmatpush3.msra.mxu0 %v3678_v42 }
 0x1d1   :  { %2621 = vmatprep.subr.mxu0 %v4216_v4 }
 0x225   :  { %v1066_v35 = vpop.f32.mrf.mxu1 }
 0x227   :  { %v2410_v60 = vpop.f32.mrf.mxu1 }
 0x22d   :  { %v915_v26 = vpop.f32.mrf.mxu0 }
 0x22e   :  { %v1067_v41 = vadd.f32 %v1066_v35, %v915_v26 }
 0x22f   :  { %v2375_v25 = vpop.f32.mrf.mxu0 }
 0x245   :  { %v1259_v56 = vpop.f32.mrf.mxu1 }
 0x247   :  { %v2480_v3 = vpop.f32.mrf.mxu1 }
 0x24e   :  { %v1170_v21 = vpop.f32.mrf.mxu0 }
 0x24f   :  { %v1171_v9 = vadd.f32 %v1170_v21, %v1067_v41 }
 0x250   :  { %v2445_v11 = vpop.f32.mrf.mxu0 }
 0x251   :  { %v1260_v17 = vadd.f32 %v1259_v56, %v1171_v9 }
 0x267   :  { %v1465_v30 = vpop.f32.mrf.mxu1 }
 0x269   :  { %v2550_v0 = vpop.f32.mrf.mxu1 }
 0x26f   :  { %v1378_v28 = vpop.f32.mrf.mxu0 }
 0x270   :  { %v1379_v46 = vadd.f32 %v1378_v28, %v1260_v17 }
 0x271   :  { %v2515_v24 = vpop.f32.mrf.mxu0 }
 0x272   :  { %v1466_v10 = vadd.f32 %v1465_v30, %v1379_v46 }
 0x274   :  { %v3948_v34 = vsub.f32 %v3728_v57, %v1466_v10 }
 0x276   :  { %v1470_v60 = vmul.f32 %v3948_v34, %v3948_v34 }
 0x278   :  { %v3952_v25 = vand.u32 4294901760, %v1470_v60 }
 0x27a   :  { %2619 = vmatmul.mubr.f32.vlgmr.msra.gmra.mxu1 %v3952_v25  ;;  %v3956_v3 = vsub.f32 %v1470_v60, %v3952_v25 }
 0x27b   :  { %2657 = vmatpush3.msra.mxu1 %v3426_v43  ;;  %2688 = vmatprep.mubr.msk.f32.mxu1 %vm2766_vm1, %v4216_v4 }
 0x27c   :  { %2658 = vmatprep.subr.mxu1 %v4216_v4  ;;  %v1554_v57 = vand.u32 4294901760, %v3956_v3 }
 0x27d   :  { %2659 = vmatpush3.msra.mxu1 %v3428_v48 }
 0x27e   :  { %2660 = vmatprep.subr.mxu1 %v4216_v4  ;;  %v1555_v10 = vsub.f32 %v3956_v3, %v1554_v57 }
 0x27f   :  { %2661 = vmatpush3.msra.mxu1 %v3430_v23 }
 0x280   :  { %2662 = vmatprep.subr.mxu1 %v4216_v4  ;;  %v1556_v24 = vand.u32 4294901760, %v1555_v10 }
 0x281   :  { %2663 = vmatpush3.msra.mxu1 %v3441_v55 }
 0x282   :  { %2664 = vmatprep.subr.mxu1 %v4216_v4  ;;  %2584 = vmatmul.mubr.f32.vlgmr.msra.gmra.mxu0 %v1556_v24 }
 0x283   :  { %2622 = vmatpush3.msra.mxu0 %v3454_v7  ;;  %2665 = vmatpush3.msra.mxu1 %v3443_v58 }
 0x284   :  { %2623 = vmatprep.subr.mxu0 %v4216_v4  ;;  %2666 = vmatprep.subr.mxu1 %v4216_v4 }
 0x285   :  { %2624 = vmatpush3.msra.mxu0 %v3457_v13  ;;  %2667 = vmatpush3.msra.mxu1 %v3445_v59 }
 0x286   :  { %2625 = vmatprep.subr.mxu0 %v4216_v4  ;;  %2668 = vmatprep.subr.mxu1 %v4216_v4 }
 0x287   :  { %2626 = vmatpush3.msra.mxu0 %v3460_v14  ;;  %2669 = vmatpush3.msra.mxu1 %v3463_v19 }
 0x288   :  { %2627 = vmatprep.subr.mxu0 %v4216_v4  ;;  %2670 = vmatprep.subr.mxu1 %v4216_v4 }
 0x289   :  { %2628 = vmatpush3.msra.mxu0 %v3466_v37  ;;  %2671 = vmatpush3.msra.mxu1 %v3485_v32 }
 0x28a   :  { %2629 = vmatprep.subr.mxu0 %v4216_v4  ;;  %2672 = vmatprep.subr.mxu1 %v4216_v4 }
 0x28b   :  { %2630 = vmatpush3.msra.mxu0 %v3469_v44  ;;  %2673 = vmatpush3.msra.mxu1 %v3534_v33 }
 0x28c   :  { %2631 = vmatprep.subr.mxu0 %v4216_v4  ;;  %2674 = vmatprep.subr.mxu1 %v4216_v4 }
 0x28d   :  { %2632 = vmatpush3.msra.mxu0 %v3473_v47  ;;  %2675 = vmatpush3.msra.mxu1 %v3536_v15 }
 0x28e   :  { %2633 = vmatprep.subr.mxu0 %v4216_v4  ;;  %2676 = vmatprep.subr.mxu1 %v4216_v4 }
 0x28f   :  { %2634 = vmatpush3.msra.mxu0 %v3492_v63  ;;  %2677 = vmatpush3.msra.mxu1 %v3610_v36 }
 0x290   :  { %2635 = vmatprep.subr.mxu0 %v4216_v4  ;;  %2678 = vmatprep.subr.mxu1 %v4216_v4 }
 0x291   :  { %2636 = vmatpush3.msra.mxu0 %v3522_v27  ;;  %2679 = vmatpush3.msra.mxu1 %v3618_v29 }
 0x292   :  { %2637 = vmatprep.subr.mxu0 %v4216_v4  ;;  %2680 = vmatprep.subr.mxu1 %v4216_v4 }
 0x293   :  { %2638 = vmatpush3.msra.mxu0 %v3549_v39  ;;  %2681 = vmatpush3.msra.mxu1 %v3631_v54 }
 0x294   :  { %2639 = vmatprep.subr.mxu0 %v4216_v4  ;;  %2682 = vmatprep.subr.mxu1 %v4216_v4 }
 0x295   :  { %2640 = vmatpush3.msra.mxu0 %v3553_v20  ;;  %2683 = vmatpush3.msra.mxu1 %v3646_v38 }
 0x296   :  { %2641 = vmatprep.subr.mxu0 %v4216_v4  ;;  %2684 = vmatprep.subr.mxu1 %v4216_v4 }
 0x297   :  { %2642 = vmatpush3.msra.mxu0 %v3616_v22  ;;  %2685 = vmatpush3.msra.mxu1 %v3664_v5 }
 0x298   :  { %2643 = vmatprep.subr.mxu0 %v4216_v4  ;;  %2686 = vmatprep.subr.mxu1 %v4216_v4 }
 0x299   :  { %2644 = vmatpush3.msra.mxu0 %v3629_v52  ;;  %2687 = vmatpush3.msra.mxu1 %v3678_v42 }
 0x29a   :  { %2645 = vmatprep.subr.mxu0 %v4216_v4  ;;  %2689 = vmatmul.mubr.f32.vlgmr.msra.gmra.mxu1 %v1554_v57 }
 0x29b   :  { %2726 = vmatprep.subr.mxu1 %v4216_v4  ;;  %2646 = vmatpush3.msra.mxu0 %v3644_v1 }
 0x29c   :  { %2727 = vmatpush3.msra.mxu1 %v3426_v43  ;;  %2647 = vmatprep.subr.mxu0 %v4216_v4  ;;  %v4237_v43 = vld [vmem:[#allocation13_spill] sm:$0xff] }
 0x29d   :  { %2728 = vmatprep.subr.mxu1 %v4216_v4  ;;  %2648 = vmatpush3.msra.mxu0 %v3661_v16 }
 0x29e   :  { %2729 = vmatpush3.msra.mxu1 %v3428_v48  ;;  %2649 = vmatprep.subr.mxu0 %v4216_v4  ;;  %v4238_v48 = vld [vmem:[#allocation15_spill] sm:$0xff] }
 0x29f   :  { %2730 = vmatprep.subr.mxu1 %v4216_v4  ;;  %2650 = vmatpush3.msra.mxu0 %v3682_v40 }
 0x2a0   :  { %2731 = vmatpush3.msra.mxu1 %v3430_v23  ;;  %2651 = vmatprep.subr.mxu0 %v4216_v4  ;;  %v4239_v23 = vld [vmem:[#allocation17_spill] sm:$0xff] }
 0x2a1   :  { %2732 = vmatprep.subr.mxu1 %v4216_v4  ;;  %2652 = vmatpush3.msra.mxu0 %v3691_v61 }
 0x2a2   :  { %2653 = vmatprep.mubr.msk.f32.mxu0 %vm2766_vm1, %v4216_v4  ;;  %2733 = vmatpush3.msra.mxu1 %v3441_v55  ;;  %v4240_v55 = vld [vmem:[#allocation19_spill] sm:$0xff] }
 0x2a3   :  { %2654 = vmatmul.mubr.f32.vlgmr.msra.gmra.mxu0 %v3956_v3  ;;  %2691 = vmatprep.subr.mxu0 %v4216_v4 }
 0x2a4   :  { %2734 = vmatprep.subr.mxu1 %v4216_v4  ;;  %2692 = vmatpush3.msra.mxu0 %v3476_v50 }
 0x2a5   :  { %2735 = vmatpush3.msra.mxu1 %v3443_v58  ;;  %2693 = vmatprep.subr.mxu0 %v4216_v4 }
 0x2a6   :  { %2736 = vmatprep.subr.mxu1 %v4216_v4  ;;  %2694 = vmatpush3.msra.mxu0 %v3479_v62 }
 0x2a7   :  { %2737 = vmatpush3.msra.mxu1 %v3445_v59  ;;  %2695 = vmatprep.subr.mxu0 %v4216_v4 }
 0x2a8   :  { %2738 = vmatprep.subr.mxu1 %v4216_v4  ;;  %2696 = vmatpush3.msra.mxu0 %v3482_v8 }
 0x2a9   :  { %2739 = vmatpush3.msra.mxu1 %v3463_v19  ;;  %2697 = vmatprep.subr.mxu0 %v4216_v4 }
 0x2aa   :  { %2740 = vmatprep.subr.mxu1 %v4216_v4  ;;  %2698 = vmatpush3.msra.mxu0 %v3488_v53 }
 0x2ab   :  { %2741 = vmatpush3.msra.mxu1 %v3485_v32  ;;  %2699 = vmatprep.subr.mxu0 %v4216_v4 }
 0x2ac   :  { %2742 = vmatprep.subr.mxu1 %v4216_v4  ;;  %2700 = vmatpush3.msra.mxu0 %v3501_v51 }
 0x2ad   :  { %2743 = vmatpush3.msra.mxu1 %v3534_v33  ;;  %2701 = vmatprep.subr.mxu0 %v4216_v4  ;;  %v2135_v33 = vld [vmem:[%s4111_s3] ss:$0 sm:$0xff] }
 0x2ae   :  { %2744 = vmatprep.subr.mxu1 %v4216_v4  ;;  %2702 = vmatpush3.msra.mxu0 %v3505_v45 }
 0x2af   :  { %2745 = vmatpush3.msra.mxu1 %v3536_v15  ;;  %2703 = vmatprep.subr.mxu0 %v4216_v4 }
 0x2b0   :  { %2746 = vmatprep.subr.mxu1 %v4216_v4  ;;  %2704 = vmatpush3.msra.mxu0 %v3525_v31 }
 0x2b1   :  { %2747 = vmatpush3.msra.mxu1 %v3610_v36  ;;  %2705 = vmatprep.subr.mxu0 %v4216_v4 }
 0x2b2   :  { %2748 = vmatprep.subr.mxu1 %v4216_v4  ;;  %2706 = vmatpush3.msra.mxu0 %v3546_v18  ;;  %v2136_v18 = vld [vmem:[%s4112_s4] ss:$0 sm:$0xff] }
 0x2b3   :  { %2749 = vmatpush3.msra.mxu1 %v3618_v29  ;;  %2707 = vmatprep.subr.mxu0 %v4216_v4 }
 0x2b4   :  { %2750 = vmatprep.subr.mxu1 %v4216_v4  ;;  %2708 = vmatpush3.msra.mxu0 %v3563_v6 }
 0x2b5   :  { %2751 = vmatpush3.msra.mxu1 %v3631_v54  ;;  %2709 = vmatprep.subr.mxu0 %v4216_v4 }
 0x2b6   :  { %2752 = vmatprep.subr.mxu1 %v4216_v4  ;;  %2710 = vmatpush3.msra.mxu0 %v3574_v12 }
 0x2b7   :  { %2753 = vmatpush3.msra.mxu1 %v3646_v38  ;;  %2711 = vmatprep.subr.mxu0 %v4216_v4 }
 0x2b8   :  { %2754 = vmatprep.subr.mxu1 %v4216_v4  ;;  %2712 = vmatpush3.msra.mxu0 %v3626_v49 }
 0x2b9   :  { %2755 = vmatpush3.msra.mxu1 %v3664_v5  ;;  %2713 = vmatprep.subr.mxu0 %v4216_v4 }
 0x2ba   :  { %2756 = vmatprep.subr.mxu1 %v4216_v4  ;;  %2714 = vmatpush3.msra.mxu0 %v3641_v2 }
 0x2bb   :  { %2757 = vmatpush3.msra.mxu1 %v3678_v42  ;;  %2758 = vmatprep.mubr.msk.f32.mxu1 %vm2766_vm1, %v4216_v4 }
 0x2bc   :  { %2715 = vmatprep.subr.mxu0 %v4216_v4  ;;  %2759 = vmatmul.mubr.f32.vlgmr.msra.gmra.mxu1 %v3952_v25 }
 0x2bd   :  { %2716 = vmatpush3.msra.mxu0 %v4237_v43  ;;  %2723 = vmatprep.mubr.msk.f32.mxu0 %vm2766_vm1, %v4216_v4 }
 0x2be   :  { %2717 = vmatprep.subr.mxu0 %v4216_v4 }
 0x2bf   :  { %2718 = vmatpush3.msra.mxu0 %v4238_v48 }
 0x2c0   :  { %2719 = vmatprep.subr.mxu0 %v4216_v4 }
 0x2c1   :  { %2720 = vmatpush3.msra.mxu0 %v4239_v23 }
 0x2c2   :  { %2721 = vmatprep.subr.mxu0 %v4216_v4 }
 0x2c3   :  { %2722 = vmatpush3.msra.mxu0 %v4240_v55 }
 0x2c4   :  { %2724 = vmatmul.mubr.f32.vlgmr.msra.gmra.mxu0 %v3952_v25 }
 0x33a   :  { %v1709_v58 = vpop.f32.mrf.mxu1 }
 0x33c   :  { %v2620_v59 = vpop.f32.mrf.mxu1 }
 0x342   :  { %v1558_v7 = vpop.f32.mrf.mxu0 }
 0x343   :  { %v1559_v47 = vadd.f32 1e-06, %v1558_v7 }
 0x344   :  { %v2585_v13 = vpop.f32.mrf.mxu0 }
 0x345   :  { %v1710_v62 = vadd.f32 %v1709_v58, %v1559_v47 }
 0x35a   :  { %v1902_v14 = vpop.f32.mrf.mxu1 }
 0x35c   :  { %v2690_v19 = vpop.f32.mrf.mxu1 }
 0x363   :  { %v1813_v37 = vpop.f32.mrf.mxu0 }
 0x364   :  { %v1814_v32 = vadd.f32 %v1813_v37, %v1710_v62 }
 0x365   :  { %v2655_v44 = vpop.f32.mrf.mxu0 }
 0x366   :  { %v1903_v53 = vadd.f32 %v1902_v14, %v1814_v32 }
 0x37c   :  { %v2108_v50 = vpop.f32.mrf.mxu1 }
 0x37e   :  { %v2760_v8 = vpop.f32.mrf.mxu1 }
 0x384   :  { %v2021_v63 = vpop.f32.mrf.mxu0 }
 0x385   :  { %v2022_v51 = vadd.f32 %v2021_v63, %v1903_v53 }
 0x386   :  { %v2725_v45 = vpop.f32.mrf.mxu0 }
 0x387   :  { %v2109_v27 = vadd.f32 %v2108_v50, %v2022_v51 }
 0x389   :  { %2763 = vrsqrt.f32 %v2109_v27 }
 0x396   :  { %v2764_v31 = vpop.eup %2763 }
 0x397   :  { %v2113_v15 = vmul.f32 %v2764_v31, %v3948_v34 }
 0x399   :  { %v2121_v39 = vmul.f32 %v2135_v33, %v2113_v15 }
 0x39b   :  { %v2129_v20 = vadd.f32 %v2136_v18, %v2121_v39 }
 0x39d   :  { %2130 = vst [vmem:[%s4113_s6] sm:$0xff] %v2129_v20 }

</bundles_post_ra>
